<compile_context>
chip_gen: v5e
topology: v5e:2x2
jax: 0.10.0
libtpu: 0.0.40
codegen_flags: <defaults>
</compile_context>

<pallas_src>
import functools

import numpy as np
import jax
import jax.numpy as jnp
from jax.experimental import pallas as pl
from jax.experimental.pallas import tpu as pltpu


# ----------------------------- schedule (host) ------------------------------
def make_linear_schedule(timesteps, linear_start=1e-4, linear_end=2e-2):
    betas = (
        np.linspace(linear_start ** 0.5, linear_end ** 0.5, timesteps, dtype=np.float64)
        ** 2
    )
    alphas = 1.0 - betas
    alphas_cumprod = np.cumprod(alphas, axis=0)
    alphas_cumprod_prev = np.append(1.0, alphas_cumprod[:-1])
    # v_posterior = 0.0 (default)
    posterior_mean_coef1 = betas * np.sqrt(alphas_cumprod_prev) / (1.0 - alphas_cumprod)
    posterior_mean_coef2 = (
        (1.0 - alphas_cumprod_prev) * np.sqrt(alphas) / (1.0 - alphas_cumprod)
    )
    return (
        posterior_mean_coef1.astype(np.float32),
        posterior_mean_coef2.astype(np.float32),
    )


# --------------------------- fused Pallas kernel -----------------------------
def make_ddpm_kernel(coef1, coef2, pool_chunk=512):
    """Builds the fused kernel with the diffusion schedule baked in as constants."""
    coef1 = tuple(float(v) for v in np.asarray(coef1, dtype=np.float32))
    coef2 = tuple(float(v) for v in np.asarray(coef2, dtype=np.float32))
    T = len(coef1)

    def kernel(
        img_ref,   # VMEM [B, C_img, H*W]  f32
        x_ref,     # VMEM [B, D]           initial noisy IPR, f32
        wc_ref,    # VMEM [C_img, D]       condition linear, f32
        bc_ref,    # VMEM [1, D]
        w1_ref,    # VMEM [D, HID]         denoise layer 1, bf16
        w2_ref,    # VMEM [D, HID]         conditioning projection, bf16
        b1_ref,    # VMEM [1, HID]
        bt_ref,    # VMEM [1, HID]         time-embedding bias
        w3_ref,    # VMEM [HID, D]         denoise layer 2, bf16
        b3_ref,    # VMEM [1, D]
        out_ref,   # VMEM [B, D]
    ):
        B, D = x_ref.shape
        C_img, HW = img_ref.shape[1], img_ref.shape[2]
        HID = w1_ref.shape[1]

        # ---- fused condition(): global-avg-pool + linear ----------------------
        # Per-channel, lane-chunked ref reads (bounded live range).  The K=C_img
        # (=4) contraction is done as unrolled VPU broadcast-FMAs — too skinny to
        # be worth an MXU pass.
        inv_hw = 1.0 / float(HW)
        chunk = min(pool_chunk, HW)
        c = jnp.zeros((B, D), jnp.float32)
        for k in range(C_img):                                     # static unroll
            s = jnp.zeros((B, 1), jnp.float32)
            for off in range(0, HW, chunk):                        # static unroll
                width = min(chunk, HW - off)
                s = s + jnp.sum(img_ref[:, k, off:off + width], axis=-1,
                                keepdims=True)
            c = c + (inv_hw * s) * wc_ref[k:k + 1, :]              # [B,1]*[1,D]
        c = c + bc_ref[...]

        # ---- hoisted loop invariants ------------------------------------------
        w1 = w1_ref[...]                                           # bf16 [D, HID]
        w3 = w3_ref[...]                                           # bf16 [HID, D]
        # conditioning projection is constant across timesteps (b1 folded in)
        cw2 = (
            jnp.dot(c.astype(jnp.bfloat16), w2_ref[...],
                    preferred_element_type=jnp.float32)
            + b1_ref[...]
        )                                                          # [B, HID] f32
        # pre-broadcast biases once (JAX does not CSE broadcast_in_dim per step)
        bt_b = jnp.broadcast_to(bt_ref[...], (B, HID))
        b3_b = jnp.broadcast_to(b3_ref[...], (B, D))

        # ---- reverse diffusion loop: fully unrolled (T static & small) ---------
        # Serial chain of 2*T dependent matmuls; schedule coefs and t_norm are
        # compile-time constants, so nothing but the state update sits on the
        # serial chain between matmuls.
        ipr = x_ref[...]
        for step in range(T):
            t = T - 1 - step                                       # reversed(range(T))
            t_norm = float(t) / float(T)
            # denoise(IPR, t, c): 2-layer MLP, time enters as a scaled bias.
            h = (
                jnp.dot(ipr.astype(jnp.bfloat16), w1,
                        preferred_element_type=jnp.float32)
                + cw2 + t_norm * bt_b
            )
            h = jnp.maximum(h, 0.0)
            model_out = (
                jnp.dot(h.astype(jnp.bfloat16), w3,
                        preferred_element_type=jnp.float32)
                + b3_b
            )
            # parameterization='x0', clip_denoised=False:
            #   model_mean = coef1[t]*x_recon + coef2[t]*x_t
            ipr = coef1[t] * model_out + coef2[t] * ipr

        out_ref[...] = ipr

    return kernel


# ------------------------------- wrapper -------------------------------------
def _nbytes(a):
    return int(np.prod(a.shape)) * a.dtype.itemsize


def ddpm_forward(img, x_noisy, params, *, coef1, coef2, batch_tile=256,
                 vmem_limit_bytes=None):
    B, C_img, H, W = img.shape
    D = params["wc"].shape[1]
    HW = H * W

    # Glue: flatten spatial dims (layout: [B, C_img, H*W], spatial on lanes).
    img_flat = img.reshape(B, C_img, HW)

    kernel = make_ddpm_kernel(coef1, coef2)

    tensor_args = (
        img_flat, x_noisy,
        params["wc"], params["bc"],
        params["w1"], params["w2"], params["b1"], params["bt"],
        params["w3"], params["b3"],
    )

    # Explicit VMEM budget (v7x physical VMEM is 64 MiB; default scoped 32 MiB).
    tile_b = min(B, batch_tile)
    if vmem_limit_bytes is None:
        resident = (
            tile_b * C_img * HW * 4          # img tile (f32)
            + tile_b * D * 4 * 2             # x tile + out tile (f32)
            + sum(_nbytes(a) for a in tensor_args[2:])
        )
        vmem_limit_bytes = int(min(64 << 20, max(16 << 20, 4 * resident)))

    if B <= batch_tile:
        # Single invocation: everything whole-array VMEM-resident, no grid.
        out = pl.pallas_call(
            kernel,
            out_shape=jax.ShapeDtypeStruct((B, D), jnp.float32),
            in_specs=[pl.BlockSpec(memory_space=pltpu.VMEM)] * len(tensor_args),
            out_specs=pl.BlockSpec(memory_space=pltpu.VMEM),
            compiler_params=pltpu.CompilerParams(
                vmem_limit_bytes=vmem_limit_bytes),
        )(*tensor_args)
    else:
        # Batched path: leading batch-tile grid axis, "parallel" so v7x's two
        # TensorCores split the tiles.  Weights get constant block indices ->
        # stay VMEM-resident, no re-DMA per batch tile.
        assert B % batch_tile == 0, "B must be a multiple of batch_tile"
        grid = (B // batch_tile,)
        weight_specs = [pl.BlockSpec(tuple(a.shape), lambda i: (0, 0))
                        for a in tensor_args[2:]]
        in_specs = [
            pl.BlockSpec((batch_tile, C_img, HW), lambda i: (i, 0, 0)),
            pl.BlockSpec((batch_tile, D), lambda i: (i, 0)),
        ] + weight_specs
        out = pl.pallas_call(
            kernel,
            out_shape=jax.ShapeDtypeStruct((B, D), jnp.float32),
            grid=grid,
            in_specs=in_specs,
            out_specs=pl.BlockSpec((batch_tile, D), lambda i: (i, 0)),
            compiler_params=pltpu.CompilerParams(
                dimension_semantics=("parallel",),
                vmem_limit_bytes=vmem_limit_bytes),
        )(*tensor_args)
    return out


# --------------------------- pure-JAX reference ------------------------------
def ddpm_forward_ref(img, x_noisy, params, *, coef1, coef2):
    B, C_img, H, W = img.shape
    coef1 = jnp.asarray(np.asarray(coef1, dtype=np.float32))
    coef2 = jnp.asarray(np.asarray(coef2, dtype=np.float32))
    T = int(coef1.shape[0])
    pooled = img.reshape(B, C_img, H * W).mean(-1)
    c = pooled @ params["wc"] + params["bc"]
    cw2 = (
        jnp.dot(c.astype(jnp.bfloat16), params["w2"],
                preferred_element_type=jnp.float32)
        + params["b1"]
    )
    ipr = x_noisy
    for t in range(T - 1, -1, -1):
        t_norm = float(t) / float(T)
        h = jnp.maximum(
            jnp.dot(ipr.astype(jnp.bfloat16), params["w1"],
                    preferred_element_type=jnp.float32)
            + cw2 + t_norm * params["bt"],
            0.0,
        )
        model_out = (
            jnp.dot(h.astype(jnp.bfloat16), params["w3"],
                    preferred_element_type=jnp.float32)
            + params["b3"]
        )
        ipr = coef1[t] * model_out + coef2[t] * ipr
    return ipr


# --------------------------------- main ---------------------------------------
if __name__ == "__main__":
    # Small, self-consistent sizes for the demo (kernel itself is batch-agnostic).
    B, C_img, H, W = 2, 4, 16, 16
    n_feats = 32
    D = n_feats * 4          # 128  (IPR / conditioning dimension)
    HID = 256                # synthetic denoise hidden width (fills v6e/v7x MXU)
    T = 8                    # num_timesteps (small for the demo)

    key = jax.random.PRNGKey(0)
    keys = jax.random.split(key, 12)

    img = jax.random.normal(keys[0], (B, C_img, H, W), dtype=jnp.float32)
    x_noisy = jax.random.normal(keys[1], (B, D), dtype=jnp.float32)  # torch.randn(shape)

    # Deterministic synthetic parameters (condition + denoise submodules).
    # Matmul weights in bf16 (MXU-native); biases / state stay f32.
    params = {
        "wc": 0.1 * jax.random.normal(keys[2], (C_img, D), dtype=jnp.float32),
        "bc": 0.01 * jax.random.normal(keys[3], (1, D), dtype=jnp.float32),
        "w1": (0.1 * jax.random.normal(keys[4], (D, HID), dtype=jnp.float32)).astype(jnp.bfloat16),
        "w2": (0.1 * jax.random.normal(keys[5], (D, HID), dtype=jnp.float32)).astype(jnp.bfloat16),
        "b1": 0.01 * jax.random.normal(keys[6], (1, HID), dtype=jnp.float32),
        "bt": 0.01 * jax.random.normal(keys[7], (1, HID), dtype=jnp.float32),
        "w3": (0.1 * jax.random.normal(keys[8], (HID, D), dtype=jnp.float32)).astype(jnp.bfloat16),
        "b3": 0.01 * jax.random.normal(keys[9], (1, D), dtype=jnp.float32),
    }

    coef1_np, coef2_np = make_linear_schedule(T)

    fwd = jax.jit(functools.partial(ddpm_forward, coef1=coef1_np, coef2=coef2_np))
    ref_fn = jax.jit(functools.partial(ddpm_forward_ref, coef1=coef1_np, coef2=coef2_np))

    out = jax.block_until_ready(fwd(img, x_noisy, params))
    ref = jax.block_until_ready(ref_fn(img, x_noisy, params))
    assert out.shape == (B, D)
    np.testing.assert_allclose(np.asarray(out), np.asarray(ref), rtol=5e-3, atol=5e-3)

    # Batched / grid-path sanity check: stack many independent diffusion chains
    # on the batch axis (the real throughput lever per the perf review) and
    # exercise the parallel batch-tile grid with VMEM-resident weights.
    Bb = 256
    img_b = jax.random.normal(keys[10], (Bb, C_img, H, W), dtype=jnp.float32)
    x_b = jax.random.normal(keys[11], (Bb, D), dtype=jnp.float32)
    fwd_b = jax.jit(functools.partial(ddpm_forward, coef1=coef1_np, coef2=coef2_np,
                                      batch_tile=128))
    out_b = jax.block_until_ready(fwd_b(img_b, x_b, params))
    ref_b = jax.block_until_ready(ref_fn(img_b, x_b, params))
    np.testing.assert_allclose(np.asarray(out_b), np.asarray(ref_b),
                               rtol=5e-3, atol=5e-3)

    # TODO(synk): the training branch (q_sample + per-step pred_IPR_list) and the
    # unused p_sample noise/variance terms are not exercised by the eval forward path.
    print("KERNEL_OK")
</pallas_src>

<mosaic_0001>
module attributes {stable_mosaic.version = 11 : i64} {
  func.func @kernel(%arg0: memref<2x4x256xf32, #tpu.memory_space<vmem>>, %arg1: memref<2x128xf32, #tpu.memory_space<vmem>>, %arg2: memref<4x128xf32, #tpu.memory_space<vmem>>, %arg3: memref<1x128xf32, #tpu.memory_space<vmem>>, %arg4: memref<128x256xbf16, #tpu.memory_space<vmem>>, %arg5: memref<128x256xbf16, #tpu.memory_space<vmem>>, %arg6: memref<1x256xf32, #tpu.memory_space<vmem>>, %arg7: memref<1x256xf32, #tpu.memory_space<vmem>>, %arg8: memref<256x128xbf16, #tpu.memory_space<vmem>>, %arg9: memref<1x128xf32, #tpu.memory_space<vmem>>, %arg10: memref<2x128xf32, #tpu.memory_space<vmem>>) attributes {dimension_semantics = [], scalar_prefetch = 0 : i64, scratch_operands = 0 : i64, tpu.core_type = #tpu.core_type<tc>} {
    %cst = arith.constant 0.000000e+00 : f32
    %0 = vector.broadcast %cst : f32 to vector<2x128xf32>
    %cst_0 = arith.constant 0.000000e+00 : f32
    %1 = vector.broadcast %cst_0 : f32 to vector<2x1xf32>
    %c0 = arith.constant 0 : index
    %c0_1 = arith.constant 0 : index
    %c0_2 = arith.constant 0 : index
    %2 = vector.load %arg0[%c0, %c0_1, %c0_2] : memref<2x4x256xf32, #tpu.memory_space<vmem>>, vector<2x1x256xf32>
    %3 = vector.shape_cast %2 : vector<2x1x256xf32> to vector<2x256xf32>
    %cst_3 = arith.constant dense<0.000000e+00> : vector<2xf32>
    %4 = vector.multi_reduction <add>, %3, %cst_3 [1] : vector<2x256xf32> to vector<2xf32>
    %5 = vector.shape_cast %4 : vector<2xf32> to vector<2x1xf32>
    %6 = arith.addf %1, %5 : vector<2x1xf32>
    %cst_4 = arith.constant 3.906250e-03 : f32
    %7 = vector.broadcast %cst_4 : f32 to vector<2x1xf32>
    %8 = arith.mulf %7, %6 : vector<2x1xf32>
    %c0_5 = arith.constant 0 : index
    %c0_6 = arith.constant 0 : index
    %9 = vector.load %arg2[%c0_5, %c0_6] : memref<4x128xf32, #tpu.memory_space<vmem>>, vector<1x128xf32>
    %10 = vector.broadcast %8 : vector<2x1xf32> to vector<2x128xf32>
    %11 = vector.broadcast %9 : vector<1x128xf32> to vector<2x128xf32>
    %12 = arith.mulf %10, %11 : vector<2x128xf32>
    %13 = arith.addf %0, %12 : vector<2x128xf32>
    %cst_7 = arith.constant 0.000000e+00 : f32
    %14 = vector.broadcast %cst_7 : f32 to vector<2x1xf32>
    %c0_8 = arith.constant 0 : index
    %c1 = arith.constant 1 : index
    %c0_9 = arith.constant 0 : index
    %15 = vector.load %arg0[%c0_8, %c1, %c0_9] : memref<2x4x256xf32, #tpu.memory_space<vmem>>, vector<2x1x256xf32>
    %16 = vector.shape_cast %15 : vector<2x1x256xf32> to vector<2x256xf32>
    %cst_10 = arith.constant dense<0.000000e+00> : vector<2xf32>
    %17 = vector.multi_reduction <add>, %16, %cst_10 [1] : vector<2x256xf32> to vector<2xf32>
    %18 = vector.shape_cast %17 : vector<2xf32> to vector<2x1xf32>
    %19 = arith.addf %14, %18 : vector<2x1xf32>
    %cst_11 = arith.constant 3.906250e-03 : f32
    %20 = vector.broadcast %cst_11 : f32 to vector<2x1xf32>
    %21 = arith.mulf %20, %19 : vector<2x1xf32>
    %c1_12 = arith.constant 1 : index
    %c0_13 = arith.constant 0 : index
    %22 = vector.load %arg2[%c1_12, %c0_13] : memref<4x128xf32, #tpu.memory_space<vmem>>, vector<1x128xf32>
    %23 = vector.broadcast %21 : vector<2x1xf32> to vector<2x128xf32>
    %24 = vector.broadcast %22 : vector<1x128xf32> to vector<2x128xf32>
    %25 = arith.mulf %23, %24 : vector<2x128xf32>
    %26 = arith.addf %13, %25 : vector<2x128xf32>
    %cst_14 = arith.constant 0.000000e+00 : f32
    %27 = vector.broadcast %cst_14 : f32 to vector<2x1xf32>
    %c0_15 = arith.constant 0 : index
    %c2 = arith.constant 2 : index
    %c0_16 = arith.constant 0 : index
    %28 = vector.load %arg0[%c0_15, %c2, %c0_16] : memref<2x4x256xf32, #tpu.memory_space<vmem>>, vector<2x1x256xf32>
    %29 = vector.shape_cast %28 : vector<2x1x256xf32> to vector<2x256xf32>
    %cst_17 = arith.constant dense<0.000000e+00> : vector<2xf32>
    %30 = vector.multi_reduction <add>, %29, %cst_17 [1] : vector<2x256xf32> to vector<2xf32>
    %31 = vector.shape_cast %30 : vector<2xf32> to vector<2x1xf32>
    %32 = arith.addf %27, %31 : vector<2x1xf32>
    %cst_18 = arith.constant 3.906250e-03 : f32
    %33 = vector.broadcast %cst_18 : f32 to vector<2x1xf32>
    %34 = arith.mulf %33, %32 : vector<2x1xf32>
    %c2_19 = arith.constant 2 : index
    %c0_20 = arith.constant 0 : index
    %35 = vector.load %arg2[%c2_19, %c0_20] : memref<4x128xf32, #tpu.memory_space<vmem>>, vector<1x128xf32>
    %36 = vector.broadcast %34 : vector<2x1xf32> to vector<2x128xf32>
    %37 = vector.broadcast %35 : vector<1x128xf32> to vector<2x128xf32>
    %38 = arith.mulf %36, %37 : vector<2x128xf32>
    %39 = arith.addf %26, %38 : vector<2x128xf32>
    %cst_21 = arith.constant 0.000000e+00 : f32
    %40 = vector.broadcast %cst_21 : f32 to vector<2x1xf32>
    %c0_22 = arith.constant 0 : index
    %c3 = arith.constant 3 : index
    %c0_23 = arith.constant 0 : index
    %41 = vector.load %arg0[%c0_22, %c3, %c0_23] : memref<2x4x256xf32, #tpu.memory_space<vmem>>, vector<2x1x256xf32>
    %42 = vector.shape_cast %41 : vector<2x1x256xf32> to vector<2x256xf32>
    %cst_24 = arith.constant dense<0.000000e+00> : vector<2xf32>
    %43 = vector.multi_reduction <add>, %42, %cst_24 [1] : vector<2x256xf32> to vector<2xf32>
    %44 = vector.shape_cast %43 : vector<2xf32> to vector<2x1xf32>
    %45 = arith.addf %40, %44 : vector<2x1xf32>
    %cst_25 = arith.constant 3.906250e-03 : f32
    %46 = vector.broadcast %cst_25 : f32 to vector<2x1xf32>
    %47 = arith.mulf %46, %45 : vector<2x1xf32>
    %c3_26 = arith.constant 3 : index
    %c0_27 = arith.constant 0 : index
    %48 = vector.load %arg2[%c3_26, %c0_27] : memref<4x128xf32, #tpu.memory_space<vmem>>, vector<1x128xf32>
    %49 = vector.broadcast %47 : vector<2x1xf32> to vector<2x128xf32>
    %50 = vector.broadcast %48 : vector<1x128xf32> to vector<2x128xf32>
    %51 = arith.mulf %49, %50 : vector<2x128xf32>
    %52 = arith.addf %39, %51 : vector<2x128xf32>
    %c0_28 = arith.constant 0 : index
    %c0_29 = arith.constant 0 : index
    %53 = vector.load %arg3[%c0_28, %c0_29] : memref<1x128xf32, #tpu.memory_space<vmem>>, vector<1x128xf32>
    %54 = vector.broadcast %53 : vector<1x128xf32> to vector<2x128xf32>
    %55 = arith.addf %52, %54 : vector<2x128xf32>
    %c0_30 = arith.constant 0 : index
    %c0_31 = arith.constant 0 : index
    %56 = vector.load %arg4[%c0_30, %c0_31] : memref<128x256xbf16, #tpu.memory_space<vmem>>, vector<128x256xbf16>
    %c0_32 = arith.constant 0 : index
    %c0_33 = arith.constant 0 : index
    %57 = vector.load %arg8[%c0_32, %c0_33] : memref<256x128xbf16, #tpu.memory_space<vmem>>, vector<256x128xbf16>
    %58 = arith.truncf %55 : vector<2x128xf32> to vector<2x128xbf16>
    %c0_34 = arith.constant 0 : index
    %c0_35 = arith.constant 0 : index
    %59 = vector.load %arg5[%c0_34, %c0_35] : memref<128x256xbf16, #tpu.memory_space<vmem>>, vector<128x256xbf16>
    %cst_36 = arith.constant dense<0.000000e+00> : vector<2x256xf32>
    %60 = tpu.matmul %58, %59, %cst_36 {dimension_numbers = #tpu.dot_dimension_numbers<[1], [0], [0], [1], [0, 0, 1, 1], [], []>} : vector<2x128xbf16>, vector<128x256xbf16>, vector<2x256xf32> -> vector<2x256xf32>
    %c0_37 = arith.constant 0 : index
    %c0_38 = arith.constant 0 : index
    %61 = vector.load %arg6[%c0_37, %c0_38] : memref<1x256xf32, #tpu.memory_space<vmem>>, vector<1x256xf32>
    %62 = vector.broadcast %61 : vector<1x256xf32> to vector<2x256xf32>
    %63 = arith.addf %60, %62 : vector<2x256xf32>
    %c0_39 = arith.constant 0 : index
    %c0_40 = arith.constant 0 : index
    %64 = vector.load %arg7[%c0_39, %c0_40] : memref<1x256xf32, #tpu.memory_space<vmem>>, vector<1x256xf32>
    %65 = vector.shape_cast %64 : vector<1x256xf32> to vector<1x256xf32>
    %66 = vector.broadcast %65 : vector<1x256xf32> to vector<2x256xf32>
    %c0_41 = arith.constant 0 : index
    %c0_42 = arith.constant 0 : index
    %67 = vector.load %arg9[%c0_41, %c0_42] : memref<1x128xf32, #tpu.memory_space<vmem>>, vector<1x128xf32>
    %68 = vector.shape_cast %67 : vector<1x128xf32> to vector<1x128xf32>
    %69 = vector.broadcast %68 : vector<1x128xf32> to vector<2x128xf32>
    %c0_43 = arith.constant 0 : index
    %c0_44 = arith.constant 0 : index
    %70 = vector.load %arg1[%c0_43, %c0_44] : memref<2x128xf32, #tpu.memory_space<vmem>>, vector<2x128xf32>
    %71 = arith.truncf %70 : vector<2x128xf32> to vector<2x128xbf16>
    %cst_45 = arith.constant dense<0.000000e+00> : vector<2x256xf32>
    %72 = tpu.matmul %71, %56, %cst_45 {dimension_numbers = #tpu.dot_dimension_numbers<[1], [0], [0], [1], [0, 0, 1, 1], [], []>} : vector<2x128xbf16>, vector<128x256xbf16>, vector<2x256xf32> -> vector<2x256xf32>
    %73 = arith.addf %72, %63 : vector<2x256xf32>
    %cst_46 = arith.constant 8.750000e-01 : f32
    %74 = vector.broadcast %cst_46 : f32 to vector<2x256xf32>
    %75 = arith.mulf %74, %66 : vector<2x256xf32>
    %76 = arith.addf %73, %75 : vector<2x256xf32>
    %cst_47 = arith.constant 0.000000e+00 : f32
    %77 = vector.broadcast %cst_47 : f32 to vector<2x256xf32>
    %78 = arith.maximumf %76, %77 : vector<2x256xf32>
    %79 = arith.truncf %78 : vector<2x256xf32> to vector<2x256xbf16>
    %cst_48 = arith.constant dense<0.000000e+00> : vector<2x128xf32>
    %80 = tpu.matmul %79, %57, %cst_48 {dimension_numbers = #tpu.dot_dimension_numbers<[1], [0], [0], [1], [0, 0, 1, 1], [], []>} : vector<2x256xbf16>, vector<256x128xbf16>, vector<2x128xf32> -> vector<2x128xf32>
    %81 = arith.addf %80, %69 : vector<2x128xf32>
    %cst_49 = arith.constant 0.330735981 : f32
    %82 = vector.broadcast %cst_49 : f32 to vector<2x128xf32>
    %83 = arith.mulf %82, %81 : vector<2x128xf32>
    %cst_50 = arith.constant 0.669160783 : f32
    %84 = vector.broadcast %cst_50 : f32 to vector<2x128xf32>
    %85 = arith.mulf %84, %70 : vector<2x128xf32>
    %86 = arith.addf %83, %85 : vector<2x128xf32>
    %87 = arith.truncf %86 : vector<2x128xf32> to vector<2x128xbf16>
    %cst_51 = arith.constant dense<0.000000e+00> : vector<2x256xf32>
    %88 = tpu.matmul %87, %56, %cst_51 {dimension_numbers = #tpu.dot_dimension_numbers<[1], [0], [0], [1], [0, 0, 1, 1], [], []>} : vector<2x128xbf16>, vector<128x256xbf16>, vector<2x256xf32> -> vector<2x256xf32>
    %89 = arith.addf %88, %63 : vector<2x256xf32>
    %cst_52 = arith.constant 7.500000e-01 : f32
    %90 = vector.broadcast %cst_52 : f32 to vector<2x256xf32>
    %91 = arith.mulf %90, %66 : vector<2x256xf32>
    %92 = arith.addf %89, %91 : vector<2x256xf32>
    %cst_53 = arith.constant 0.000000e+00 : f32
    %93 = vector.broadcast %cst_53 : f32 to vector<2x256xf32>
    %94 = arith.maximumf %92, %93 : vector<2x256xf32>
    %95 = arith.truncf %94 : vector<2x256xf32> to vector<2x256xbf16>
    %cst_54 = arith.constant dense<0.000000e+00> : vector<2x128xf32>
    %96 = tpu.matmul %95, %57, %cst_54 {dimension_numbers = #tpu.dot_dimension_numbers<[1], [0], [0], [1], [0, 0, 1, 1], [], []>} : vector<2x256xbf16>, vector<256x128xbf16>, vector<2x128xf32> -> vector<2x128xf32>
    %97 = arith.addf %96, %69 : vector<2x128xf32>
    %cst_55 = arith.constant 0.370798707 : f32
    %98 = vector.broadcast %cst_55 : f32 to vector<2x128xf32>
    %99 = arith.mulf %98, %97 : vector<2x128xf32>
    %cst_56 = arith.constant 0.629152595 : f32
    %100 = vector.broadcast %cst_56 : f32 to vector<2x128xf32>
    %101 = arith.mulf %100, %86 : vector<2x128xf32>
    %102 = arith.addf %99, %101 : vector<2x128xf32>
    %103 = arith.truncf %102 : vector<2x128xf32> to vector<2x128xbf16>
    %cst_57 = arith.constant dense<0.000000e+00> : vector<2x256xf32>
    %104 = tpu.matmul %103, %56, %cst_57 {dimension_numbers = #tpu.dot_dimension_numbers<[1], [0], [0], [1], [0, 0, 1, 1], [], []>} : vector<2x128xbf16>, vector<128x256xbf16>, vector<2x256xf32> -> vector<2x256xf32>
    %105 = arith.addf %104, %63 : vector<2x256xf32>
    %cst_58 = arith.constant 6.250000e-01 : f32
    %106 = vector.broadcast %cst_58 : f32 to vector<2x256xf32>
    %107 = arith.mulf %106, %66 : vector<2x256xf32>
    %108 = arith.addf %105, %107 : vector<2x256xf32>
    %cst_59 = arith.constant 0.000000e+00 : f32
    %109 = vector.broadcast %cst_59 : f32 to vector<2x256xf32>
    %110 = arith.maximumf %108, %109 : vector<2x256xf32>
    %111 = arith.truncf %110 : vector<2x256xf32> to vector<2x256xbf16>
    %cst_60 = arith.constant dense<0.000000e+00> : vector<2x128xf32>
    %112 = tpu.matmul %111, %57, %cst_60 {dimension_numbers = #tpu.dot_dimension_numbers<[1], [0], [0], [1], [0, 0, 1, 1], [], []>} : vector<2x256xbf16>, vector<256x128xbf16>, vector<2x128xf32> -> vector<2x128xf32>
    %113 = arith.addf %112, %69 : vector<2x128xf32>
    %cst_61 = arith.constant 0.421826601 : f32
    %114 = vector.broadcast %cst_61 : f32 to vector<2x128xf32>
    %115 = arith.mulf %114, %113 : vector<2x128xf32>
    %cst_62 = arith.constant 0.578153253 : f32
    %116 = vector.broadcast %cst_62 : f32 to vector<2x128xf32>
    %117 = arith.mulf %116, %102 : vector<2x128xf32>
    %118 = arith.addf %115, %117 : vector<2x128xf32>
    %119 = arith.truncf %118 : vector<2x128xf32> to vector<2x128xbf16>
    %cst_63 = arith.constant dense<0.000000e+00> : vector<2x256xf32>
    %120 = tpu.matmul %119, %56, %cst_63 {dimension_numbers = #tpu.dot_dimension_numbers<[1], [0], [0], [1], [0, 0, 1, 1], [], []>} : vector<2x128xbf16>, vector<128x256xbf16>, vector<2x256xf32> -> vector<2x256xf32>
    %121 = arith.addf %120, %63 : vector<2x256xf32>
    %cst_64 = arith.constant 5.000000e-01 : f32
    %122 = vector.broadcast %cst_64 : f32 to vector<2x256xf32>
    %123 = arith.mulf %122, %66 : vector<2x256xf32>
    %124 = arith.addf %121, %123 : vector<2x256xf32>
    %cst_65 = arith.constant 0.000000e+00 : f32
    %125 = vector.broadcast %cst_65 : f32 to vector<2x256xf32>
    %126 = arith.maximumf %124, %125 : vector<2x256xf32>
    %127 = arith.truncf %126 : vector<2x256xf32> to vector<2x256xbf16>
    %cst_66 = arith.constant dense<0.000000e+00> : vector<2x128xf32>
    %128 = tpu.matmul %127, %57, %cst_66 {dimension_numbers = #tpu.dot_dimension_numbers<[1], [0], [0], [1], [0, 0, 1, 1], [], []>} : vector<2x256xbf16>, vector<256x128xbf16>, vector<2x128xf32> -> vector<2x128xf32>
    %129 = arith.addf %128, %69 : vector<2x128xf32>
    %cst_67 = arith.constant 0.48882246 : f32
    %130 = vector.broadcast %cst_67 : f32 to vector<2x128xf32>
    %131 = arith.mulf %130, %129 : vector<2x128xf32>
    %cst_68 = arith.constant 0.511170626 : f32
    %132 = vector.broadcast %cst_68 : f32 to vector<2x128xf32>
    %133 = arith.mulf %132, %118 : vector<2x128xf32>
    %134 = arith.addf %131, %133 : vector<2x128xf32>
    %135 = arith.truncf %134 : vector<2x128xf32> to vector<2x128xbf16>
    %cst_69 = arith.constant dense<0.000000e+00> : vector<2x256xf32>
    %136 = tpu.matmul %135, %56, %cst_69 {dimension_numbers = #tpu.dot_dimension_numbers<[1], [0], [0], [1], [0, 0, 1, 1], [], []>} : vector<2x128xbf16>, vector<128x256xbf16>, vector<2x256xf32> -> vector<2x256xf32>
    %137 = arith.addf %136, %63 : vector<2x256xf32>
    %cst_70 = arith.constant 3.750000e-01 : f32
    %138 = vector.broadcast %cst_70 : f32 to vector<2x256xf32>
    %139 = arith.mulf %138, %66 : vector<2x256xf32>
    %140 = arith.addf %137, %139 : vector<2x256xf32>
    %cst_71 = arith.constant 0.000000e+00 : f32
    %141 = vector.broadcast %cst_71 : f32 to vector<2x256xf32>
    %142 = arith.maximumf %140, %141 : vector<2x256xf32>
    %143 = arith.truncf %142 : vector<2x256xf32> to vector<2x256xbf16>
    %cst_72 = arith.constant dense<0.000000e+00> : vector<2x128xf32>
    %144 = tpu.matmul %143, %57, %cst_72 {dimension_numbers = #tpu.dot_dimension_numbers<[1], [0], [0], [1], [0, 0, 1, 1], [], []>} : vector<2x256xbf16>, vector<256x128xbf16>, vector<2x128xf32> -> vector<2x128xf32>
    %145 = arith.addf %144, %69 : vector<2x128xf32>
    %cst_73 = arith.constant 0.580043435 : f32
    %146 = vector.broadcast %cst_73 : f32 to vector<2x128xf32>
    %147 = arith.mulf %146, %145 : vector<2x128xf32>
    %cst_74 = arith.constant 0.419954807 : f32
    %148 = vector.broadcast %cst_74 : f32 to vector<2x128xf32>
    %149 = arith.mulf %148, %134 : vector<2x128xf32>
    %150 = arith.addf %147, %149 : vector<2x128xf32>
    %151 = arith.truncf %150 : vector<2x128xf32> to vector<2x128xbf16>
    %cst_75 = arith.constant dense<0.000000e+00> : vector<2x256xf32>
    %152 = tpu.matmul %151, %56, %cst_75 {dimension_numbers = #tpu.dot_dimension_numbers<[1], [0], [0], [1], [0, 0, 1, 1], [], []>} : vector<2x128xbf16>, vector<128x256xbf16>, vector<2x256xf32> -> vector<2x256xf32>
    %153 = arith.addf %152, %63 : vector<2x256xf32>
    %cst_76 = arith.constant 2.500000e-01 : f32
    %154 = vector.broadcast %cst_76 : f32 to vector<2x256xf32>
    %155 = arith.mulf %154, %66 : vector<2x256xf32>
    %156 = arith.addf %153, %155 : vector<2x256xf32>
    %cst_77 = arith.constant 0.000000e+00 : f32
    %157 = vector.broadcast %cst_77 : f32 to vector<2x256xf32>
    %158 = arith.maximumf %156, %157 : vector<2x256xf32>
    %159 = arith.truncf %158 : vector<2x256xf32> to vector<2x256xbf16>
    %cst_78 = arith.constant dense<0.000000e+00> : vector<2x128xf32>
    %160 = tpu.matmul %159, %57, %cst_78 {dimension_numbers = #tpu.dot_dimension_numbers<[1], [0], [0], [1], [0, 0, 1, 1], [], []>} : vector<2x256xbf16>, vector<256x128xbf16>, vector<2x128xf32> -> vector<2x128xf32>
    %161 = arith.addf %160, %69 : vector<2x128xf32>
    %cst_79 = arith.constant 0.709153354 : f32
    %162 = vector.broadcast %cst_79 : f32 to vector<2x128xf32>
    %163 = arith.mulf %162, %161 : vector<2x128xf32>
    %cst_80 = arith.constant 0.290846407 : f32
    %164 = vector.broadcast %cst_80 : f32 to vector<2x128xf32>
    %165 = arith.mulf %164, %150 : vector<2x128xf32>
    %166 = arith.addf %163, %165 : vector<2x128xf32>
    %167 = arith.truncf %166 : vector<2x128xf32> to vector<2x128xbf16>
    %cst_81 = arith.constant dense<0.000000e+00> : vector<2x256xf32>
    %168 = tpu.matmul %167, %56, %cst_81 {dimension_numbers = #tpu.dot_dimension_numbers<[1], [0], [0], [1], [0, 0, 1, 1], [], []>} : vector<2x128xbf16>, vector<128x256xbf16>, vector<2x256xf32> -> vector<2x256xf32>
    %169 = arith.addf %168, %63 : vector<2x256xf32>
    %cst_82 = arith.constant 1.250000e-01 : f32
    %170 = vector.broadcast %cst_82 : f32 to vector<2x256xf32>
    %171 = arith.mulf %170, %66 : vector<2x256xf32>
    %172 = arith.addf %169, %171 : vector<2x256xf32>
    %cst_83 = arith.constant 0.000000e+00 : f32
    %173 = vector.broadcast %cst_83 : f32 to vector<2x256xf32>
    %174 = arith.maximumf %172, %173 : vector<2x256xf32>
    %175 = arith.truncf %174 : vector<2x256xf32> to vector<2x256xbf16>
    %cst_84 = arith.constant dense<0.000000e+00> : vector<2x128xf32>
    %176 = tpu.matmul %175, %57, %cst_84 {dimension_numbers = #tpu.dot_dimension_numbers<[1], [0], [0], [1], [0, 0, 1, 1], [], []>} : vector<2x256xbf16>, vector<256x128xbf16>, vector<2x128xf32> -> vector<2x128xf32>
    %177 = arith.addf %176, %69 : vector<2x128xf32>
    %cst_85 = arith.constant 0.892272949 : f32
    %178 = vector.broadcast %cst_85 : f32 to vector<2x128xf32>
    %179 = arith.mulf %178, %177 : vector<2x128xf32>
    %cst_86 = arith.constant 0.107727021 : f32
    %180 = vector.broadcast %cst_86 : f32 to vector<2x128xf32>
    %181 = arith.mulf %180, %166 : vector<2x128xf32>
    %182 = arith.addf %179, %181 : vector<2x128xf32>
    %183 = arith.truncf %182 : vector<2x128xf32> to vector<2x128xbf16>
    %cst_87 = arith.constant dense<0.000000e+00> : vector<2x256xf32>
    %184 = tpu.matmul %183, %56, %cst_87 {dimension_numbers = #tpu.dot_dimension_numbers<[1], [0], [0], [1], [0, 0, 1, 1], [], []>} : vector<2x128xbf16>, vector<128x256xbf16>, vector<2x256xf32> -> vector<2x256xf32>
    %185 = arith.addf %184, %63 : vector<2x256xf32>
    %cst_88 = arith.constant 0.000000e+00 : f32
    %186 = vector.broadcast %cst_88 : f32 to vector<2x256xf32>
    %187 = arith.mulf %186, %66 : vector<2x256xf32>
    %188 = arith.addf %185, %187 : vector<2x256xf32>
    %cst_89 = arith.constant 0.000000e+00 : f32
    %189 = vector.broadcast %cst_89 : f32 to vector<2x256xf32>
    %190 = arith.maximumf %188, %189 : vector<2x256xf32>
    %191 = arith.truncf %190 : vector<2x256xf32> to vector<2x256xbf16>
    %cst_90 = arith.constant dense<0.000000e+00> : vector<2x128xf32>
    %192 = tpu.matmul %191, %57, %cst_90 {dimension_numbers = #tpu.dot_dimension_numbers<[1], [0], [0], [1], [0, 0, 1, 1], [], []>} : vector<2x256xbf16>, vector<256x128xbf16>, vector<2x128xf32> -> vector<2x128xf32>
    %193 = arith.addf %192, %69 : vector<2x128xf32>
    %cst_91 = arith.constant 1.000000e+00 : f32
    %194 = vector.broadcast %cst_91 : f32 to vector<2x128xf32>
    %195 = arith.mulf %194, %193 : vector<2x128xf32>
    %cst_92 = arith.constant 0.000000e+00 : f32
    %196 = vector.broadcast %cst_92 : f32 to vector<2x128xf32>
    %197 = arith.mulf %196, %182 : vector<2x128xf32>
    %198 = arith.addf %195, %197 : vector<2x128xf32>
    %c0_93 = arith.constant 0 : index
    %c0_94 = arith.constant 0 : index
    %199 = vector.load %arg10[%c0_93, %c0_94] : memref<2x128xf32, #tpu.memory_space<vmem>>, vector<2x128xf32>
    tpu.vector_store %arg10[%c0_93, %c0_94], %198 {strides = array<i32>} : memref<2x128xf32, #tpu.memory_space<vmem>>, vector<2x128xf32>,
    return
  }
}

</mosaic_0001>

<bundles_post_ra>
// kernel: ddpm_forward.1
= control target key start
LH: loop header
LB: loop body
LE: loop exit
PB: predicated region body
PF: predicated region fallthrough
CT: control target
= control target key end

     0   :  { %15 = vsyncpa [#allocation3], 0  ;;  %s2002_s0 = inlined_call_operand.vmem [shape: f32[2,4,256], index: 0, kind: input, shape index: {}]   ;;  %s2003_s1 = inlined_call_operand.vmem [shape: f32[2,128], index: 1, kind: input, shape index: {}]   ;;  %s2004_s2 = inlined_call_operand.vmem [shape: f32[4,128], index: 2, kind: input, shape index: {}]   ;;  %s2005_s3 = inlined_call_operand.vmem [shape: f32[1,128], index: 3, kind: input, shape index: {}]   ;;  %s2006_s4 = inlined_call_operand.vmem [shape: bf16[128,256], index: 4, kind: input, shape index: {}]   ;;  %s2007_s5 = inlined_call_operand.hbm [shape: bf16[128,256], index: 5, kind: input, shape index: {}]   ;;  %s2008_s6 = inlined_call_operand.vmem [shape: f32[1,256], index: 6, kind: input, shape index: {}]   ;;  %s2009_s7 = inlined_call_operand.vmem [shape: f32[1,256], index: 7, kind: input, shape index: {}]   ;;  %s2010_s8 = inlined_call_operand.hbm [shape: bf16[256,128], index: 8, kind: input, shape index: {}]   ;;  %s2011_s9 = inlined_call_operand.vmem [shape: f32[1,128], index: 9, kind: input, shape index: {}]   ;;  %s2012_s10 = inlined_call_operand.hbm [shape: f32[2,128], index: 10, kind: output, shape index: {}]  }
   0x1   :  { %16 = vsyncpa [#allocation6], 0 }
   0x2   :  { %17 = vsyncpa [#allocation4], 0  ;;  %s32_s15 = sshll.u32 %s2007_s5, 4  ;;  %s1401_s16 = smov [#allocation2]   ;;  %s33_s15 = int_to_ptr.hbm [resolvable:$true] %s32_s15 }
   0x3   :  { %s34_s17 = sshll.u32 %s1401_s16, 4  ;;  %s49_s20 = sshll.u32 %s2010_s8, 4  ;;  %s35_s17 = int_to_ptr.vmem [resolvable:$true] %s34_s17  ;;  %s50_s20 = int_to_ptr.hbm [resolvable:$true] %s49_s20 }
   0x4   :  { %s1402_s21 = smov 128   ;;  %s1403_s22 = smov 8  }
   0x5   :  { %40 = dma.hbm_to_vmem [thread:$0]  %s33_s15, 2048, %s35_s17, [#allocation3], %s1402_s21, %s1402_s21, %s1403_s22  }
   0x6   :  { %s1404_s23 = smov [#allocation5]   ;;  %s1405_s25 = smov 64  }
   0x7   :  { %s51_s24 = sshll.u32 %s1404_s23, 4  ;;  %s1406_s26 = smov 4   ;;  %s52_s24 = int_to_ptr.vmem [resolvable:$true] %s51_s24 }
   0x8   :  { %57 = dma.hbm_to_vmem [thread:$0]  %s50_s20, 2048, %s52_s24, [#allocation6], %s1405_s25, %s1405_s25, %s1406_s26  }
   0x9   :  { %1395 = dma.done.wait [#allocation3], 2048  }
   0xa   :  { %1396 = vsyncadd [#allocation3], 4294965248 }
   0xb   :  { %1397 = dma.done.wait [#allocation6], 2048  }
   0xc   :  { %1398 = vsyncadd [#allocation6], 4294965248  ;;  %v68_v0 = vld [vmem:[%s2002_s0] ss:$4 sm:$0x3]  ;;  %vm80_vm0 = vcmask 1041408  }
   0xd   :  { %v1063_v1 = vld [vmem:[%s2002_s0 + $0x8] ss:$4 sm:$0x3]  ;;  %73 = vst [vmem:[#allocation1] ss:$9 sm:$0xff] %v68_v0  ;;  %s1052_s29 = sshll.u32 %s2012_s10, 4  ;;  %s1053_s29 = int_to_ptr.hbm [resolvable:$true] %s1052_s29 }
   0xe   :  { %75 = vst [vmem:[#allocation1 + $0x1] ss:$9 sm:$0xff] %v1063_v1  ;;  %v1064_v2 = vld [vmem:[%s2002_s0 + $0x1] ss:$4 sm:$0x3] }
   0xf   :  { %v1065_v3 = vld [vmem:[%s2002_s0 + $0x9] ss:$4 sm:$0x3]  ;;  %v1192_v4 = vld [vmem:[%s2006_s4 + $0x70] sm:$0xf] }
  0x10   :  { %v1277_v5 = vld [vmem:[%s2006_s4 + $0x74] sm:$0xf0]  ;;  %v1276_v6 = vld [vmem:[%s2006_s4 + $0x74] sm:$0xf]  ;;  %v1194_v10 = vld [vmem:[%s2006_s4 + $0x78] sm:$0xf0] }
  0x11   :  { %v1490_v9 = vor.u32 %v1277_v5, %v1192_v4  ;;  %v1497_v13 = vor.u32 %v1276_v6, %v1194_v10  ;;  %v1184_v14 = vld [vmem:[%s2006_s4 + $0x60] sm:$0xf]  ;;  %v1275_v16 = vld [vmem:[%s2006_s4 + $0x64] sm:$0xf0]  ;;  %v1274_v17 = vld [vmem:[%s2006_s4 + $0x64] sm:$0xf] }
  0x12   :  { %v1510_v18 = vor.u32 %v1275_v16, %v1184_v14  ;;  %v1186_v19 = vld [vmem:[%s2006_s4 + $0x68] sm:$0xf0]  ;;  %v1176_v20 = vld [vmem:[%s2006_s4 + $0x50] sm:$0xf]  ;;  %v1273_v21 = vld [vmem:[%s2006_s4 + $0x54] sm:$0xf0] }
  0x13   :  { %438 = vmatpush.bf16.msra.mxu2 %v1490_v9  ;;  %451 = vmatpush.bf16.msra.mxu3 %v1497_v13  ;;  %v1521_v22 = vor.u32 %v1274_v17, %v1186_v19  ;;  %v1272_v23 = vld [vmem:[%s2006_s4 + $0x54] sm:$0xf]  ;;  %v1178_v24 = vld [vmem:[%s2006_s4 + $0x58] sm:$0xf0]  ;;  %v1128_v25 = vld [vmem:[#allocation2 + $0x70] sm:$0xf]  ;;  %v1533_v30 = vor.u32 %v1273_v21, %v1176_v20 }
  0x14   :  { %v1309_v26 = vld [vmem:[#allocation2 + $0x74] sm:$0xf0]  ;;  %v1308_v27 = vld [vmem:[#allocation2 + $0x74] sm:$0xf]  ;;  %v1130_v28 = vld [vmem:[#allocation2 + $0x78] sm:$0xf0]  ;;  %v1536_v33 = vor.u32 %v1272_v23, %v1178_v24 }
  0x15   :  { %v76_v7 = vld [vmem:[#allocation1] sm:$0xff]  ;;  %v77_v8 = vld [vmem:[#allocation1 + $0x9] sm:$0xff]  ;;  %v1129_v31 = vor.u32 %v1309_v26, %v1128_v25  ;;  %v1133_v32 = vor.u32 %v1308_v27, %v1130_v28  ;;  %v1122_v61 = vld [vmem:[#allocation2 + $0x68] sm:$0xf0] }
  0x16   :  { %v81_v11 = vsel %vm80_vm0, %v76_v7, 0.0  ;;  %v82_v12 = vsel %vm80_vm0, %v77_v8, 0.0  ;;  %98 = vst [vmem:[#allocation1] ss:$9 sm:$0xff] %v1064_v2  ;;  %v1168_v34 = vld [vmem:[%s2006_s4 + $0x40] sm:$0xf] }
  0x17   :  { %v83_v15 = vadd.f32 %v82_v12, %v81_v11  ;;  %100 = vst [vmem:[#allocation1 + $0x1] ss:$9 sm:$0xff] %v1065_v3  ;;  %v1066_v29 = vld [vmem:[%s2002_s0 + $0x2] ss:$4 sm:$0x3]  ;;  %439 = vmatpush.bf16.msra.mxu2 %v1510_v18  ;;  %452 = vmatpush.bf16.msra.mxu3 %v1521_v22 }
  0x18   :  { %v1271_v35 = vld [vmem:[%s2006_s4 + $0x44] sm:$0xf0]  ;;  %320 = vmatpush.bf16.msra.mxu0 %v1129_v31  ;;  %333 = vmatpush.bf16.msra.mxu1 %v1133_v32  ;;  %v1068_v43 = vld [vmem:[%s2002_s0 + $0x3] ss:$4 sm:$0x3] }
  0x19   :  { %84 = vadd.xlane.f32.xlu0 %v83_v15  ;;  %v1067_v36 = vld [vmem:[%s2002_s0 + $0xa] ss:$4 sm:$0x3]  ;;  %v1550_v41 = vor.u32 %v1271_v35, %v1168_v34  ;;  %v1069_v44 = vld [vmem:[%s2002_s0 + $0xb] ss:$4 sm:$0x3] }
  0x1a   :  { %v1270_v55 = vld [vmem:[%s2006_s4 + $0x44] sm:$0xf]  ;;  %v1170_v56 = vld [vmem:[%s2006_s4 + $0x48] sm:$0xf0]  ;;  %v1120_v57 = vld [vmem:[#allocation2 + $0x60] sm:$0xf] }
  0x1b   :  { %440 = vmatpush.bf16.msra.mxu2 %v1533_v30  ;;  %453 = vmatpush.bf16.msra.mxu3 %v1536_v33  ;;  %v1570_v58 = vor.u32 %v1270_v55, %v1170_v56  ;;  %v1307_v59 = vld [vmem:[#allocation2 + $0x64] sm:$0xf0]  ;;  %v1306_v60 = vld [vmem:[#allocation2 + $0x64] sm:$0xf]  ;;  %v1269_v1 = vld [vmem:[%s2006_s4 + $0x34] sm:$0xf0] }
  0x1c   :  { %v1121_v62 = vor.u32 %v1307_v59, %v1120_v57  ;;  %v1125_v63 = vor.u32 %v1306_v60, %v1122_v61  ;;  %v1160_v0 = vld [vmem:[%s2006_s4 + $0x30] sm:$0xf]  ;;  %v1268_v2 = vld [vmem:[%s2006_s4 + $0x34] sm:$0xf]  ;;  %v1162_v4 = vld [vmem:[%s2006_s4 + $0x38] sm:$0xf0] }
  0x1d   :  { %v1582_v3 = vor.u32 %v1269_v1, %v1160_v0  ;;  %v1112_v5 = vld [vmem:[#allocation2 + $0x50] sm:$0xf]  ;;  %v1305_v6 = vld [vmem:[#allocation2 + $0x54] sm:$0xf0]  ;;  %v1587_v7 = vor.u32 %v1268_v2, %v1162_v4  ;;  %v1304_v10 = vld [vmem:[#allocation2 + $0x54] sm:$0xf] }
  0x1e   :  { %v101_v37 = vld [vmem:[#allocation1] sm:$0xff]  ;;  %v102_v38 = vld [vmem:[#allocation1 + $0x9] sm:$0xff]  ;;  %321 = vmatpush.bf16.msra.mxu0 %v1121_v62  ;;  %334 = vmatpush.bf16.msra.mxu1 %v1125_v63  ;;  %v1113_v8 = vor.u32 %v1305_v6, %v1112_v5  ;;  %v1106_v25 = vld [vmem:[#allocation2 + $0x48] sm:$0xf0] }
  0x1f   :  { %v105_v39 = vsel %vm80_vm0, %v101_v37, 0.0  ;;  %v106_v40 = vsel %vm80_vm0, %v102_v38, 0.0  ;;  %122 = vst [vmem:[#allocation1] ss:$9 sm:$0xff] %v1066_v29  ;;  %441 = vmatpush.bf16.msra.mxu2 %v1550_v41  ;;  %454 = vmatpush.bf16.msra.mxu3 %v1570_v58  ;;  %v1114_v11 = vld [vmem:[#allocation2 + $0x58] sm:$0xf0] }
  0x20   :  { %v107_v42 = vadd.f32 %v106_v40, %v105_v39  ;;  %124 = vst [vmem:[#allocation1 + $0x1] ss:$9 sm:$0xff] %v1067_v36  ;;  %v1152_v12 = vld [vmem:[%s2006_s4 + $0x20] sm:$0xf]  ;;  %v1117_v14 = vor.u32 %v1304_v10, %v1114_v11  ;;  %v1267_v15 = vld [vmem:[%s2006_s4 + $0x24] sm:$0xf0] }
  0x21   :  { %v1596_v16 = vor.u32 %v1267_v15, %v1152_v12  ;;  %v1266_v17 = vld [vmem:[%s2006_s4 + $0x24] sm:$0xf]  ;;  %v1154_v19 = vld [vmem:[%s2006_s4 + $0x28] sm:$0xf0]  ;;  %v1104_v20 = vld [vmem:[#allocation2 + $0x40] sm:$0xf] }
  0x22   :  { %108 = vadd.xlane.f32.xlu0 %v107_v42  ;;  %322 = vmatpush.bf16.msra.mxu0 %v1113_v8  ;;  %v1606_v21 = vor.u32 %v1266_v17, %v1154_v19  ;;  %v1303_v23 = vld [vmem:[#allocation2 + $0x44] sm:$0xf0]  ;;  %v1302_v24 = vld [vmem:[#allocation2 + $0x44] sm:$0xf]  ;;  %v1265_v29 = vld [vmem:[%s2006_s4 + $0x14] sm:$0xf0] }
  0x23   :  { %442 = vmatpush.bf16.msra.mxu2 %v1582_v3  ;;  %455 = vmatpush.bf16.msra.mxu3 %v1587_v7  ;;  %v1105_v26 = vor.u32 %v1303_v23, %v1104_v20  ;;  %v1109_v27 = vor.u32 %v1302_v24, %v1106_v25  ;;  %v1144_v28 = vld [vmem:[%s2006_s4 + $0x10] sm:$0xf]  ;;  %v1264_v32 = vld [vmem:[%s2006_s4 + $0x14] sm:$0xf]  ;;  %v1146_v34 = vld [vmem:[%s2006_s4 + $0x18] sm:$0xf0] }
  0x24   :  { %335 = vmatpush.bf16.msra.mxu1 %v1117_v14  ;;  %v1615_v31 = vor.u32 %v1265_v29, %v1144_v28  ;;  %v1624_v35 = vor.u32 %v1264_v32, %v1146_v34  ;;  %v1096_v36 = vld [vmem:[#allocation2 + $0x30] sm:$0xf]  ;;  %v1301_v37 = vld [vmem:[#allocation2 + $0x34] sm:$0xf0]  ;;  %v1300_v38 = vld [vmem:[#allocation2 + $0x34] sm:$0xf] }
  0x25   :  { %v1097_v39 = vor.u32 %v1301_v37, %v1096_v36  ;;  %v1098_v40 = vld [vmem:[#allocation2 + $0x38] sm:$0xf0]  ;;  %v1136_v42 = vld [vmem:[%s2006_s4] sm:$0xf]  ;;  %v1090_v55 = vld [vmem:[#allocation2 + $0x28] sm:$0xf0] }
  0x26   :  { %323 = vmatpush.bf16.msra.mxu0 %v1105_v26  ;;  %v1080_v57 = vld [vmem:[#allocation2 + $0x10] sm:$0xf]  ;;  %v1297_v59 = vld [vmem:[#allocation2 + $0x14] sm:$0xf0]  ;;  %v1296_v60 = vld [vmem:[#allocation2 + $0x14] sm:$0xf] }
  0x27   :  { %v125_v45 = vld [vmem:[#allocation1] sm:$0xff]  ;;  %v126_v46 = vld [vmem:[#allocation1 + $0x9] sm:$0xff]  ;;  %443 = vmatpush.bf16.msra.mxu2 %v1596_v16  ;;  %456 = vmatpush.bf16.msra.mxu3 %v1606_v21  ;;  %v1081_v61 = vor.u32 %v1297_v59, %v1080_v57  ;;  %v1074_v5 = vld [vmem:[#allocation2 + $0x8] sm:$0xf0] }
  0x28   :  { %v129_v47 = vsel %vm80_vm0, %v125_v45, 0.0  ;;  %v130_v48 = vsel %vm80_vm0, %v126_v46, 0.0  ;;  %146 = vst [vmem:[#allocation1] ss:$9 sm:$0xff] %v1068_v43  ;;  %336 = vmatpush.bf16.msra.mxu1 %v1109_v27  ;;  %v1263_v43 = vld [vmem:[%s2006_s4 + $0x4] sm:$0xf0] }
  0x29   :  { %v131_v49 = vadd.f32 %v130_v48, %v129_v47  ;;  %148 = vst [vmem:[#allocation1 + $0x1] ss:$9 sm:$0xff] %v1069_v44  ;;  %v1101_v44 = vor.u32 %v1300_v38, %v1098_v40  ;;  %v1633_v45 = vor.u32 %v1263_v43, %v1136_v42  ;;  %v1262_v46 = vld [vmem:[%s2006_s4 + $0x4] sm:$0xf]  ;;  %v1138_v47 = vld [vmem:[%s2006_s4 + $0x8] sm:$0xf0] }
  0x2a   :  { %324 = vmatpush.bf16.msra.mxu0 %v1097_v39  ;;  %v1641_v48 = vor.u32 %v1262_v46, %v1138_v47  ;;  %v1082_v62 = vld [vmem:[#allocation2 + $0x18] sm:$0xf0]  ;;  %v1072_v0 = vld [vmem:[#allocation2] sm:$0xf]  ;;  %v1295_v1 = vld [vmem:[#allocation2 + $0x4] sm:$0xf0] }
  0x2b   :  { %132 = vadd.xlane.f32.xlu1 %v131_v49  ;;  %444 = vmatpush.bf16.msra.mxu2 %v1615_v31  ;;  %v1646_v49 = vld [vmem:[%s2003_s1] sm:$0x3]  ;;  %v1085_v63 = vor.u32 %v1296_v60, %v1082_v62  ;;  %v1294_v2 = vld [vmem:[#allocation2 + $0x4] sm:$0xf]  ;;  %v1073_v4 = vor.u32 %v1295_v1, %v1072_v0  ;;  %v1666_v12 = vld [vmem:[#allocation5 + $0x30] sm:$0xff] }
  0x2c   :  { %457 = vmatpush.bf16.msra.mxu3 %v1624_v35  ;;  %337 = vmatpush.bf16.msra.mxu1 %v1101_v44  ;;  %v1077_v6 = vor.u32 %v1294_v2, %v1074_v5  ;;  %v1659_v8 = vld [vmem:[#allocation5 + $0x38] sm:$0xff]  ;;  %v1668_v14 = vld [vmem:[#allocation5 + $0x70] sm:$0xff]  ;;  %v1674_v15 = vld [vmem:[#allocation5 + $0x28] sm:$0xff] }
  0x2d   :  { %v1661_v10 = vld [vmem:[#allocation5 + $0x78] sm:$0xff]  ;;  %v1676_v17 = vld [vmem:[#allocation5 + $0x68] sm:$0xff]  ;;  %v1682_v19 = vld [vmem:[#allocation5 + $0x20] sm:$0xff] }
  0x2e   :  { %v1684_v20 = vld [vmem:[#allocation5 + $0x60] sm:$0xff]  ;;  %v1317_v25 = vld [vmem:[%s2004_s2] ss:$0 sm:$0xff]  ;;  %v1318_v27 = vld [vmem:[%s2004_s2 + $0x1] ss:$0 sm:$0xff] }
  0x2f   :  { %445 = vmatpush.bf16.msra.mxu2 %v1633_v45  ;;  %v1319_v29 = vld [vmem:[%s2004_s2 + $0x2] ss:$0 sm:$0xff]  ;;  %v1320_v38 = vld [vmem:[%s2004_s2 + $0x3] ss:$0 sm:$0xff]  ;;  %v1321_v46 = vld [vmem:[%s2005_s3] ss:$0 sm:$0xff] }
  0x30   :  { %v149_v50 = vld [vmem:[#allocation1] sm:$0xff]  ;;  %v150_v51 = vld [vmem:[#allocation1 + $0x9] sm:$0xff]  ;;  %458 = vmatpush.bf16.msra.mxu3 %v1641_v48  ;;  %v1731_v57 = vld [vmem:[#allocation5 + $0x50] sm:$0xff] }
  0x31   :  { %v153_v52 = vsel %vm80_vm0, %v149_v50, 0.0  ;;  %v154_v53 = vsel %vm80_vm0, %v150_v51, 0.0  ;;  %v1088_v50 = vld [vmem:[#allocation2 + $0x20] sm:$0xf]  ;;  %v1299_v51 = vld [vmem:[#allocation2 + $0x24] sm:$0xf0] }
  0x32   :  { %v155_v54 = vadd.f32 %v154_v53, %v153_v52  ;;  %v357_v52 = vpack.c.bf16 %v1646_v49, %v1646_v49  ;;  %v1089_v53 = vor.u32 %v1299_v51, %v1088_v50  ;;  %v1735_v59 = vld [vmem:[#allocation5 + $0x8] sm:$0xff]  ;;  %v1743_v0 = vld [vmem:[#allocation5 + $0x40] sm:$0xff]  ;;  %v234_v1 = vld [vmem:[%s2008_s6] sm:$0x3] }
  0x33   :  { %598 = vmatpush.bf16.msrb.mxu2 %v1490_v9  ;;  %v1737_v60 = vld [vmem:[#allocation5 + $0x48] sm:$0xff]  ;;  %v346_v2 = vld [vmem:[%s2009_s7] sm:$0x3]  ;;  %v237_v5 = vperm.slane %v234_v1, 1 }
  0x34   :  { %156 = vadd.xlane.f32.xlu1 %v155_v54  ;;  %v1298_v54 = vld [vmem:[#allocation2 + $0x24] sm:$0xf]  ;;  %611 = vmatpush.bf16.msrb.mxu3 %v1497_v13 }
  0x35   :  { %v1093_v56 = vor.u32 %v1298_v54, %v1090_v55  ;;  %446 = vmatmul.bf16.vlgmr.msra.gmra.mxu2 %v357_v52  ;;  %325 = vmatpush.bf16.msra.mxu0 %v1089_v53  ;;  %v1725_v53 = vld [vmem:[#allocation5 + $0x58] sm:$0xff] }
  0x36   :  { %459 = vmatmul.bf16.vlgmr.msra.gmra.mxu3 %v357_v52  ;;  %v1723_v52 = vld [vmem:[#allocation5 + $0x18] sm:$0xff] }
  0x37   :  { %338 = vmatpush.bf16.msra.mxu1 %v1093_v56  ;;  %599 = vmatpush.bf16.msrb.mxu2 %v1510_v18  ;;  %v1729_v56 = vld [vmem:[#allocation5 + $0x10] sm:$0xff] }
  0x38   :  { %612 = vmatpush.bf16.msrb.mxu3 %v1521_v22 }
  0x39   :  { %326 = vmatpush.bf16.msra.mxu0 %v1081_v61 }
  0x3b   :  { %339 = vmatpush.bf16.msra.mxu1 %v1085_v63  ;;  %600 = vmatpush.bf16.msrb.mxu2 %v1533_v30  ;;  %v1741_v63 = vld [vmem:[#allocation5] sm:$0xff] }
  0x3c   :  { %613 = vmatpush.bf16.msrb.mxu3 %v1536_v33 }
  0x3d   :  { %327 = vmatpush.bf16.msra.mxu0 %v1073_v4  ;;  %v236_v4 = vperm.slane %v234_v1, 0 }
  0x3f   :  { %340 = vmatpush.bf16.msra.mxu1 %v1077_v6  ;;  %601 = vmatpush.bf16.msrb.mxu2 %v1550_v41  ;;  %v1763_v6 = vperm.slane %v346_v2, 0 }
  0x40   :  { %614 = vmatpush.bf16.msrb.mxu3 %v1570_v58 }
  0x41   :  { %568 = vmatpush.bf16.msrb.mxu0 %v1659_v8 }
  0x43   :  { %581 = vmatpush.bf16.msrb.mxu1 %v1661_v10  ;;  %602 = vmatpush.bf16.msrb.mxu2 %v1582_v3 }
  0x44   :  { %615 = vmatpush.bf16.msrb.mxu3 %v1587_v7 }
  0x45   :  { %569 = vmatpush.bf16.msrb.mxu0 %v1666_v12 }
  0x47   :  { %582 = vmatpush.bf16.msrb.mxu1 %v1668_v14  ;;  %603 = vmatpush.bf16.msrb.mxu2 %v1596_v16 }
  0x48   :  { %616 = vmatpush.bf16.msrb.mxu3 %v1606_v21 }
  0x49   :  { %570 = vmatpush.bf16.msrb.mxu0 %v1674_v15 }
  0x4b   :  { %583 = vmatpush.bf16.msrb.mxu1 %v1676_v17  ;;  %604 = vmatpush.bf16.msrb.mxu2 %v1615_v31 }
  0x4c   :  { %617 = vmatpush.bf16.msrb.mxu3 %v1624_v35 }
  0x4d   :  { %571 = vmatpush.bf16.msrb.mxu0 %v1682_v19 }
  0x4f   :  { %584 = vmatpush.bf16.msrb.mxu1 %v1684_v20  ;;  %605 = vmatpush.bf16.msrb.mxu2 %v1633_v45 }
  0x50   :  { %618 = vmatpush.bf16.msrb.mxu3 %v1641_v48 }
  0x51   :  { %572 = vmatpush.bf16.msrb.mxu0 %v1723_v52 }
  0x53   :  { %662 = vmatpush.bf16.msra.mxu2 %v1490_v9  ;;  %585 = vmatpush.bf16.msrb.mxu1 %v1725_v53 }
  0x54   :  { %675 = vmatpush.bf16.msra.mxu3 %v1497_v13 }
  0x55   :  { %573 = vmatpush.bf16.msrb.mxu0 %v1729_v56 }
  0x57   :  { %663 = vmatpush.bf16.msra.mxu2 %v1510_v18  ;;  %586 = vmatpush.bf16.msrb.mxu1 %v1731_v57 }
  0x58   :  { %676 = vmatpush.bf16.msra.mxu3 %v1521_v22 }
  0x59   :  { %574 = vmatpush.bf16.msrb.mxu0 %v1735_v59 }
  0x5b   :  { %664 = vmatpush.bf16.msra.mxu2 %v1533_v30  ;;  %587 = vmatpush.bf16.msrb.mxu1 %v1737_v60 }
  0x5c   :  { %677 = vmatpush.bf16.msra.mxu3 %v1536_v33 }
  0x5d   :  { %575 = vmatpush.bf16.msrb.mxu0 %v1741_v63 }
  0x5f   :  { %665 = vmatpush.bf16.msra.mxu2 %v1550_v41  ;;  %588 = vmatpush.bf16.msrb.mxu1 %v1743_v0 }
  0x60   :  { %678 = vmatpush.bf16.msra.mxu3 %v1570_v58 }
  0x63   :  { %666 = vmatpush.bf16.msra.mxu2 %v1582_v3 }
  0x64   :  { %679 = vmatpush.bf16.msra.mxu3 %v1587_v7 }
  0x67   :  { %667 = vmatpush.bf16.msra.mxu2 %v1596_v16 }
  0x68   :  { %680 = vmatpush.bf16.msra.mxu3 %v1606_v21 }
  0x6b   :  { %668 = vmatpush.bf16.msra.mxu2 %v1615_v31 }
  0x6c   :  { %681 = vmatpush.bf16.msra.mxu3 %v1624_v35 }
  0x6f   :  { %669 = vmatpush.bf16.msra.mxu2 %v1633_v45 }
  0x70   :  { %682 = vmatpush.bf16.msra.mxu3 %v1641_v48 }
  0x8c   :  { %v85_v11 = vpop.xlane.xlu0 %84 }
  0x8d   :  { %v87_v26 = vmul.f32 0.00390625, %v85_v11  ;;  %v1765_v11 = vperm.slane %v346_v2, 1 }
  0x8f   :  { %v90_v34 = vmul.f32 %v1317_v25, %v87_v26 }
  0x95   :  { %v109_v23 = vpop.xlane.xlu0 %108 }
  0x96   :  { %v111_v28 = vmul.f32 0.00390625, %v109_v23 }
  0x98   :  { %v114_v36 = vmul.f32 %v1318_v27, %v111_v28  ;;  %v464_v27 = vmul.f32 0.875, %v1763_v6  ;;  %v465_v28 = vmul.f32 0.875, %v1765_v11 }
  0x9a   :  { %v115_v40 = vadd.f32 %v114_v36, %v90_v34 }
  0x9e   :  { %v133_v24 = vpop.xlane.xlu1 %132 }
  0x9f   :  { %v135_v32 = vmul.f32 0.00390625, %v133_v24 }
  0xa1   :  { %v138_v37 = vmul.f32 %v1319_v29, %v135_v32 }
  0xa3   :  { %v139_v43 = vadd.f32 %v138_v37, %v115_v40 }
  0xa7   :  { %v157_v39 = vpop.xlane.xlu1 %156 }
  0xa8   :  { %v159_v42 = vmul.f32 0.00390625, %v157_v39 }
  0xaa   :  { %v162_v44 = vmul.f32 %v1320_v38, %v159_v42 }
  0xac   :  { %v163_v47 = vadd.f32 %v162_v44, %v139_v43  ;;  %v1800_v44 = vld [vmem:[%s2011_s9] ss:$0 sm:$0xff]  ;;  %s1407_s9 = smov [#allocation7]  }
  0xad   :  { %s1050_s27 = sshll.u32 %s1407_s9, 4  ;;  %s1051_s27 = int_to_ptr.vmem [resolvable:$true] %s1050_s27 }
  0xae   :  { %v168_v50 = vadd.f32 %v1321_v46, %v163_v47 }
  0xb0   :  { %v217_v51 = vpack.c.bf16 %v168_v50, %v168_v50 }
  0xb2   :  { %328 = vmatmul.bf16.vlgmr.msra.gmra.mxu0 %v217_v51  ;;  %341 = vmatmul.bf16.vlgmr.msra.gmra.mxu1 %v217_v51  ;;  %v595_v51 = vmul.f32 0.6691608, %v1646_v49  ;;  %v624_v49 = vmul.f32 0.75, %v1763_v6 }
  0xb3   :  { %632 = vmatpush.bf16.msra.mxu0 %v1659_v8  ;;  %645 = vmatpush.bf16.msra.mxu1 %v1661_v10 }
  0xb7   :  { %633 = vmatpush.bf16.msra.mxu0 %v1666_v12  ;;  %646 = vmatpush.bf16.msra.mxu1 %v1668_v14 }
  0xb8   :  { %v447_v54 = vpop.f32.mrf.mxu2 }
  0xb9   :  { %v460_v55 = vpop.f32.mrf.mxu3 }
  0xbb   :  { %634 = vmatpush.bf16.msra.mxu0 %v1674_v15  ;;  %647 = vmatpush.bf16.msra.mxu1 %v1676_v17 }
  0xbf   :  { %635 = vmatpush.bf16.msra.mxu0 %v1682_v19  ;;  %648 = vmatpush.bf16.msra.mxu1 %v1684_v20 }
  0xc0   :  { %v449_v61 = vpop.f32.mrf.mxu2 }
  0xc1   :  { %v462_v62 = vpop.f32.mrf.mxu3 }
  0xc3   :  { %636 = vmatpush.bf16.msra.mxu0 %v1723_v52  ;;  %649 = vmatpush.bf16.msra.mxu1 %v1725_v53 }
  0xc7   :  { %637 = vmatpush.bf16.msra.mxu0 %v1729_v56  ;;  %650 = vmatpush.bf16.msra.mxu1 %v1731_v57 }
  0xcb   :  { %638 = vmatpush.bf16.msra.mxu0 %v1735_v59  ;;  %651 = vmatpush.bf16.msra.mxu1 %v1737_v60 }
  0xcf   :  { %639 = vmatpush.bf16.msra.mxu0 %v1741_v63  ;;  %652 = vmatpush.bf16.msra.mxu1 %v1743_v0 }
 0x12f   :  { %v329_v23 = vpop.f32.mrf.mxu0  ;;  %v342_v24 = vpop.f32.mrf.mxu1 }
 0x130   :  { %v1769_v25 = vadd.f32 %v329_v23, %v236_v4  ;;  %v1771_v26 = vadd.f32 %v342_v24, %v237_v5  ;;  %v625_v4 = vmul.f32 0.75, %v1765_v11 }
 0x132   :  { %v448_v29 = vadd.f32 %v447_v54, %v1769_v25  ;;  %v461_v32 = vadd.f32 %v460_v55, %v1771_v26 }
 0x134   :  { %v466_v34 = vadd.f32 %v464_v27, %v448_v29  ;;  %v467_v36 = vadd.f32 %v465_v28, %v461_v32 }
 0x136   :  { %v468_v37 = vmax.f32 %v466_v34, 0.0  ;;  %v469_v38 = vmax.f32 %v467_v36, 0.0 }
 0x137   :  { %v331_v39 = vpop.f32.mrf.mxu0  ;;  %v344_v40 = vpop.f32.mrf.mxu1 }
 0x138   :  { %v470_v42 = vpack.c.bf16 %v468_v37, %v468_v37  ;;  %v471_v43 = vpack.c.bf16 %v469_v38, %v469_v38 }
 0x13a   :  { %576 = vmatmul.bf16.vlgmr.msrb.gmra.mxu0 %v470_v42  ;;  %589 = vmatmul.bf16.vlgmr.msrb.gmra.mxu1 %v471_v43 }
 0x13b   :  { %696 = vmatpush.bf16.msrb.mxu0 %v1659_v8  ;;  %709 = vmatpush.bf16.msrb.mxu1 %v1661_v10 }
 0x13f   :  { %697 = vmatpush.bf16.msrb.mxu0 %v1666_v12  ;;  %710 = vmatpush.bf16.msrb.mxu1 %v1668_v14 }
 0x143   :  { %698 = vmatpush.bf16.msrb.mxu0 %v1674_v15  ;;  %711 = vmatpush.bf16.msrb.mxu1 %v1676_v17 }
 0x147   :  { %699 = vmatpush.bf16.msrb.mxu0 %v1682_v19  ;;  %712 = vmatpush.bf16.msrb.mxu1 %v1684_v20 }
 0x14b   :  { %700 = vmatpush.bf16.msrb.mxu0 %v1723_v52  ;;  %713 = vmatpush.bf16.msrb.mxu1 %v1725_v53 }
 0x14f   :  { %701 = vmatpush.bf16.msrb.mxu0 %v1729_v56  ;;  %714 = vmatpush.bf16.msrb.mxu1 %v1731_v57 }
 0x153   :  { %702 = vmatpush.bf16.msrb.mxu0 %v1735_v59  ;;  %715 = vmatpush.bf16.msrb.mxu1 %v1737_v60 }
 0x157   :  { %703 = vmatpush.bf16.msrb.mxu0 %v1741_v63  ;;  %716 = vmatpush.bf16.msrb.mxu1 %v1743_v0 }
 0x1b7   :  { %v577_v46 = vpop.f32.mrf.mxu0  ;;  %v590_v47 = vpop.f32.mrf.mxu1 }
 0x1b8   :  { %v578_v50 = vadd.f32 %v1800_v44, %v577_v46 }
 0x1ba   :  { %v591_v54 = vadd.f32 %v590_v47, %v578_v50 }
 0x1bc   :  { %v594_v55 = vmul.f32 0.33073598, %v591_v54 }
 0x1be   :  { %v596_v61 = vadd.f32 %v595_v51, %v594_v55 }
 0x1bf   :  { %v579_v62 = vpop.f32.mrf.mxu0  ;;  %v592_v1 = vpop.f32.mrf.mxu1 }
 0x1c0   :  { %v597_v2 = vpack.c.bf16 %v596_v61, %v596_v61  ;;  %v659_v50 = vmul.f32 0.6291526, %v596_v61  ;;  %v688_v61 = vmul.f32 0.625, %v1763_v6  ;;  %v689_v1 = vmul.f32 0.625, %v1765_v11 }
 0x1c2   :  { %606 = vmatmul.bf16.vlgmr.msrb.gmra.mxu2 %v597_v2  ;;  %619 = vmatmul.bf16.vlgmr.msrb.gmra.mxu3 %v597_v2 }
 0x1c3   :  { %726 = vmatpush.bf16.msrb.mxu2 %v1490_v9  ;;  %739 = vmatpush.bf16.msrb.mxu3 %v1497_v13 }
 0x1c7   :  { %727 = vmatpush.bf16.msrb.mxu2 %v1510_v18  ;;  %740 = vmatpush.bf16.msrb.mxu3 %v1521_v22 }
 0x1cb   :  { %728 = vmatpush.bf16.msrb.mxu2 %v1533_v30  ;;  %741 = vmatpush.bf16.msrb.mxu3 %v1536_v33 }
 0x1cf   :  { %729 = vmatpush.bf16.msrb.mxu2 %v1550_v41  ;;  %742 = vmatpush.bf16.msrb.mxu3 %v1570_v58 }
 0x1d3   :  { %730 = vmatpush.bf16.msrb.mxu2 %v1582_v3  ;;  %743 = vmatpush.bf16.msrb.mxu3 %v1587_v7 }
 0x1d7   :  { %731 = vmatpush.bf16.msrb.mxu2 %v1596_v16  ;;  %744 = vmatpush.bf16.msrb.mxu3 %v1606_v21 }
 0x1db   :  { %732 = vmatpush.bf16.msrb.mxu2 %v1615_v31  ;;  %745 = vmatpush.bf16.msrb.mxu3 %v1624_v35 }
 0x1df   :  { %733 = vmatpush.bf16.msrb.mxu2 %v1633_v45  ;;  %746 = vmatpush.bf16.msrb.mxu3 %v1641_v48 }
 0x245   :  { %v607_v5 = vpop.f32.mrf.mxu2  ;;  %v620_v23 = vpop.f32.mrf.mxu3 }
 0x246   :  { %v608_v24 = vadd.f32 %v607_v5, %v1769_v25  ;;  %v621_v27 = vadd.f32 %v620_v23, %v1771_v26 }
 0x248   :  { %v626_v28 = vadd.f32 %v624_v49, %v608_v24  ;;  %v627_v29 = vadd.f32 %v625_v4, %v621_v27 }
 0x24a   :  { %v628_v32 = vmax.f32 %v626_v28, 0.0  ;;  %v629_v34 = vmax.f32 %v627_v29, 0.0 }
 0x24c   :  { %v630_v36 = vpack.c.bf16 %v628_v32, %v628_v32  ;;  %v631_v37 = vpack.c.bf16 %v629_v34, %v629_v34 }
 0x24d   :  { %v609_v38 = vpop.f32.mrf.mxu2  ;;  %v622_v39 = vpop.f32.mrf.mxu3 }
 0x24e   :  { %640 = vmatmul.bf16.vlgmr.msra.gmra.mxu0 %v630_v36  ;;  %653 = vmatmul.bf16.vlgmr.msra.gmra.mxu1 %v631_v37 }
 0x24f   :  { %760 = vmatpush.bf16.msra.mxu0 %v1659_v8  ;;  %773 = vmatpush.bf16.msra.mxu1 %v1661_v10 }
 0x253   :  { %761 = vmatpush.bf16.msra.mxu0 %v1666_v12  ;;  %774 = vmatpush.bf16.msra.mxu1 %v1668_v14 }
 0x257   :  { %762 = vmatpush.bf16.msra.mxu0 %v1674_v15  ;;  %775 = vmatpush.bf16.msra.mxu1 %v1676_v17 }
 0x25b   :  { %763 = vmatpush.bf16.msra.mxu0 %v1682_v19  ;;  %776 = vmatpush.bf16.msra.mxu1 %v1684_v20 }
 0x25f   :  { %764 = vmatpush.bf16.msra.mxu0 %v1723_v52  ;;  %777 = vmatpush.bf16.msra.mxu1 %v1725_v53 }
 0x263   :  { %765 = vmatpush.bf16.msra.mxu0 %v1729_v56  ;;  %778 = vmatpush.bf16.msra.mxu1 %v1731_v57 }
 0x267   :  { %766 = vmatpush.bf16.msra.mxu0 %v1735_v59  ;;  %779 = vmatpush.bf16.msra.mxu1 %v1737_v60 }
 0x26b   :  { %767 = vmatpush.bf16.msra.mxu0 %v1741_v63  ;;  %780 = vmatpush.bf16.msra.mxu1 %v1743_v0 }
 0x2cb   :  { %v641_v40 = vpop.f32.mrf.mxu0  ;;  %v654_v42 = vpop.f32.mrf.mxu1 }
 0x2cc   :  { %v642_v43 = vadd.f32 %v1800_v44, %v641_v40 }
 0x2ce   :  { %v655_v46 = vadd.f32 %v654_v42, %v642_v43 }
 0x2d0   :  { %v658_v47 = vmul.f32 0.3707987, %v655_v46 }
 0x2d2   :  { %v660_v51 = vadd.f32 %v659_v50, %v658_v47 }
 0x2d3   :  { %v643_v54 = vpop.f32.mrf.mxu0  ;;  %v656_v55 = vpop.f32.mrf.mxu1 }
 0x2d4   :  { %v661_v62 = vpack.c.bf16 %v660_v51, %v660_v51  ;;  %v723_v43 = vmul.f32 0.57815325, %v660_v51  ;;  %v752_v51 = vmul.f32 0.5, %v1763_v6  ;;  %v753_v55 = vmul.f32 0.5, %v1765_v11 }
 0x2d6   :  { %670 = vmatmul.bf16.vlgmr.msra.gmra.mxu2 %v661_v62  ;;  %683 = vmatmul.bf16.vlgmr.msra.gmra.mxu3 %v661_v62 }
 0x2d7   :  { %790 = vmatpush.bf16.msra.mxu2 %v1490_v9  ;;  %803 = vmatpush.bf16.msra.mxu3 %v1497_v13 }
 0x2db   :  { %791 = vmatpush.bf16.msra.mxu2 %v1510_v18  ;;  %804 = vmatpush.bf16.msra.mxu3 %v1521_v22 }
 0x2df   :  { %792 = vmatpush.bf16.msra.mxu2 %v1533_v30  ;;  %805 = vmatpush.bf16.msra.mxu3 %v1536_v33 }
 0x2e3   :  { %793 = vmatpush.bf16.msra.mxu2 %v1550_v41  ;;  %806 = vmatpush.bf16.msra.mxu3 %v1570_v58 }
 0x2e7   :  { %794 = vmatpush.bf16.msra.mxu2 %v1582_v3  ;;  %807 = vmatpush.bf16.msra.mxu3 %v1587_v7 }
 0x2eb   :  { %795 = vmatpush.bf16.msra.mxu2 %v1596_v16  ;;  %808 = vmatpush.bf16.msra.mxu3 %v1606_v21 }
 0x2ef   :  { %796 = vmatpush.bf16.msra.mxu2 %v1615_v31  ;;  %809 = vmatpush.bf16.msra.mxu3 %v1624_v35 }
 0x2f3   :  { %797 = vmatpush.bf16.msra.mxu2 %v1633_v45  ;;  %810 = vmatpush.bf16.msra.mxu3 %v1641_v48 }
 0x359   :  { %v671_v2 = vpop.f32.mrf.mxu2  ;;  %v684_v49 = vpop.f32.mrf.mxu3 }
 0x35a   :  { %v672_v4 = vadd.f32 %v671_v2, %v1769_v25  ;;  %v685_v5 = vadd.f32 %v684_v49, %v1771_v26 }
 0x35c   :  { %v690_v23 = vadd.f32 %v688_v61, %v672_v4  ;;  %v691_v24 = vadd.f32 %v689_v1, %v685_v5 }
 0x35e   :  { %v692_v27 = vmax.f32 %v690_v23, 0.0  ;;  %v693_v28 = vmax.f32 %v691_v24, 0.0 }
 0x360   :  { %v694_v29 = vpack.c.bf16 %v692_v27, %v692_v27  ;;  %v695_v32 = vpack.c.bf16 %v693_v28, %v693_v28 }
 0x361   :  { %v673_v34 = vpop.f32.mrf.mxu2  ;;  %v686_v36 = vpop.f32.mrf.mxu3 }
 0x362   :  { %704 = vmatmul.bf16.vlgmr.msrb.gmra.mxu0 %v694_v29  ;;  %717 = vmatmul.bf16.vlgmr.msrb.gmra.mxu1 %v695_v32 }
 0x363   :  { %824 = vmatpush.bf16.msrb.mxu0 %v1659_v8  ;;  %837 = vmatpush.bf16.msrb.mxu1 %v1661_v10 }
 0x367   :  { %825 = vmatpush.bf16.msrb.mxu0 %v1666_v12  ;;  %838 = vmatpush.bf16.msrb.mxu1 %v1668_v14 }
 0x36b   :  { %826 = vmatpush.bf16.msrb.mxu0 %v1674_v15  ;;  %839 = vmatpush.bf16.msrb.mxu1 %v1676_v17 }
 0x36f   :  { %827 = vmatpush.bf16.msrb.mxu0 %v1682_v19  ;;  %840 = vmatpush.bf16.msrb.mxu1 %v1684_v20 }
 0x373   :  { %828 = vmatpush.bf16.msrb.mxu0 %v1723_v52  ;;  %841 = vmatpush.bf16.msrb.mxu1 %v1725_v53 }
 0x377   :  { %829 = vmatpush.bf16.msrb.mxu0 %v1729_v56  ;;  %842 = vmatpush.bf16.msrb.mxu1 %v1731_v57 }
 0x37b   :  { %830 = vmatpush.bf16.msrb.mxu0 %v1735_v59  ;;  %843 = vmatpush.bf16.msrb.mxu1 %v1737_v60 }
 0x37f   :  { %831 = vmatpush.bf16.msrb.mxu0 %v1741_v63  ;;  %844 = vmatpush.bf16.msrb.mxu1 %v1743_v0 }
 0x3df   :  { %v705_v37 = vpop.f32.mrf.mxu0  ;;  %v718_v38 = vpop.f32.mrf.mxu1 }
 0x3e0   :  { %v706_v39 = vadd.f32 %v1800_v44, %v705_v37 }
 0x3e2   :  { %v719_v40 = vadd.f32 %v718_v38, %v706_v39 }
 0x3e4   :  { %v722_v42 = vmul.f32 0.4218266, %v719_v40 }
 0x3e6   :  { %v724_v46 = vadd.f32 %v723_v43, %v722_v42 }
 0x3e7   :  { %v707_v47 = vpop.f32.mrf.mxu0  ;;  %v720_v50 = vpop.f32.mrf.mxu1 }
 0x3e8   :  { %v725_v54 = vpack.c.bf16 %v724_v46, %v724_v46  ;;  %v787_v39 = vmul.f32 0.5111706, %v724_v46  ;;  %v816_v46 = vmul.f32 0.375, %v1763_v6  ;;  %v817_v50 = vmul.f32 0.375, %v1765_v11 }
 0x3ea   :  { %734 = vmatmul.bf16.vlgmr.msrb.gmra.mxu2 %v725_v54  ;;  %747 = vmatmul.bf16.vlgmr.msrb.gmra.mxu3 %v725_v54 }
 0x3eb   :  { %854 = vmatpush.bf16.msrb.mxu2 %v1490_v9  ;;  %867 = vmatpush.bf16.msrb.mxu3 %v1497_v13 }
 0x3ef   :  { %855 = vmatpush.bf16.msrb.mxu2 %v1510_v18  ;;  %868 = vmatpush.bf16.msrb.mxu3 %v1521_v22 }
 0x3f3   :  { %856 = vmatpush.bf16.msrb.mxu2 %v1533_v30  ;;  %869 = vmatpush.bf16.msrb.mxu3 %v1536_v33 }
 0x3f7   :  { %857 = vmatpush.bf16.msrb.mxu2 %v1550_v41  ;;  %870 = vmatpush.bf16.msrb.mxu3 %v1570_v58 }
 0x3fb   :  { %858 = vmatpush.bf16.msrb.mxu2 %v1582_v3  ;;  %871 = vmatpush.bf16.msrb.mxu3 %v1587_v7 }
 0x3ff   :  { %859 = vmatpush.bf16.msrb.mxu2 %v1596_v16  ;;  %872 = vmatpush.bf16.msrb.mxu3 %v1606_v21 }
 0x403   :  { %860 = vmatpush.bf16.msrb.mxu2 %v1615_v31  ;;  %873 = vmatpush.bf16.msrb.mxu3 %v1624_v35 }
 0x407   :  { %861 = vmatpush.bf16.msrb.mxu2 %v1633_v45  ;;  %874 = vmatpush.bf16.msrb.mxu3 %v1641_v48 }
 0x46d   :  { %v735_v62 = vpop.f32.mrf.mxu2  ;;  %v748_v61 = vpop.f32.mrf.mxu3 }
 0x46e   :  { %v736_v1 = vadd.f32 %v735_v62, %v1769_v25  ;;  %v749_v2 = vadd.f32 %v748_v61, %v1771_v26 }
 0x470   :  { %v754_v49 = vadd.f32 %v752_v51, %v736_v1  ;;  %v755_v4 = vadd.f32 %v753_v55, %v749_v2 }
 0x472   :  { %v756_v5 = vmax.f32 %v754_v49, 0.0  ;;  %v757_v23 = vmax.f32 %v755_v4, 0.0 }
 0x474   :  { %v758_v24 = vpack.c.bf16 %v756_v5, %v756_v5  ;;  %v759_v27 = vpack.c.bf16 %v757_v23, %v757_v23 }
 0x475   :  { %v737_v28 = vpop.f32.mrf.mxu2  ;;  %v750_v29 = vpop.f32.mrf.mxu3 }
 0x476   :  { %768 = vmatmul.bf16.vlgmr.msra.gmra.mxu0 %v758_v24  ;;  %781 = vmatmul.bf16.vlgmr.msra.gmra.mxu1 %v759_v27 }
 0x477   :  { %888 = vmatpush.bf16.msra.mxu0 %v1659_v8  ;;  %901 = vmatpush.bf16.msra.mxu1 %v1661_v10 }
 0x47b   :  { %889 = vmatpush.bf16.msra.mxu0 %v1666_v12  ;;  %902 = vmatpush.bf16.msra.mxu1 %v1668_v14 }
 0x47f   :  { %890 = vmatpush.bf16.msra.mxu0 %v1674_v15  ;;  %903 = vmatpush.bf16.msra.mxu1 %v1676_v17 }
 0x483   :  { %891 = vmatpush.bf16.msra.mxu0 %v1682_v19  ;;  %904 = vmatpush.bf16.msra.mxu1 %v1684_v20 }
 0x487   :  { %892 = vmatpush.bf16.msra.mxu0 %v1723_v52  ;;  %905 = vmatpush.bf16.msra.mxu1 %v1725_v53 }
 0x48b   :  { %893 = vmatpush.bf16.msra.mxu0 %v1729_v56  ;;  %906 = vmatpush.bf16.msra.mxu1 %v1731_v57 }
 0x48f   :  { %894 = vmatpush.bf16.msra.mxu0 %v1735_v59  ;;  %907 = vmatpush.bf16.msra.mxu1 %v1737_v60 }
 0x493   :  { %895 = vmatpush.bf16.msra.mxu0 %v1741_v63  ;;  %908 = vmatpush.bf16.msra.mxu1 %v1743_v0 }
 0x4f3   :  { %v769_v32 = vpop.f32.mrf.mxu0  ;;  %v782_v34 = vpop.f32.mrf.mxu1 }
 0x4f4   :  { %v770_v36 = vadd.f32 %v1800_v44, %v769_v32 }
 0x4f6   :  { %v783_v37 = vadd.f32 %v782_v34, %v770_v36 }
 0x4f8   :  { %v786_v38 = vmul.f32 0.48882246, %v783_v37 }
 0x4fa   :  { %v788_v40 = vadd.f32 %v787_v39, %v786_v38 }
 0x4fb   :  { %v771_v42 = vpop.f32.mrf.mxu0  ;;  %v784_v43 = vpop.f32.mrf.mxu1 }
 0x4fc   :  { %v789_v47 = vpack.c.bf16 %v788_v40, %v788_v40  ;;  %v851_v36 = vmul.f32 0.4199548, %v788_v40 }
 0x4fe   :  { %798 = vmatmul.bf16.vlgmr.msra.gmra.mxu2 %v789_v47  ;;  %811 = vmatmul.bf16.vlgmr.msra.gmra.mxu3 %v789_v47 }
 0x4ff   :  { %918 = vmatpush.bf16.msra.mxu2 %v1490_v9  ;;  %931 = vmatpush.bf16.msra.mxu3 %v1497_v13 }
 0x503   :  { %919 = vmatpush.bf16.msra.mxu2 %v1510_v18  ;;  %932 = vmatpush.bf16.msra.mxu3 %v1521_v22 }
 0x507   :  { %920 = vmatpush.bf16.msra.mxu2 %v1533_v30  ;;  %933 = vmatpush.bf16.msra.mxu3 %v1536_v33 }
 0x50b   :  { %921 = vmatpush.bf16.msra.mxu2 %v1550_v41  ;;  %934 = vmatpush.bf16.msra.mxu3 %v1570_v58 }
 0x50f   :  { %922 = vmatpush.bf16.msra.mxu2 %v1582_v3  ;;  %935 = vmatpush.bf16.msra.mxu3 %v1587_v7 }
 0x513   :  { %923 = vmatpush.bf16.msra.mxu2 %v1596_v16  ;;  %936 = vmatpush.bf16.msra.mxu3 %v1606_v21 }
 0x517   :  { %924 = vmatpush.bf16.msra.mxu2 %v1615_v31  ;;  %937 = vmatpush.bf16.msra.mxu3 %v1624_v35 }
 0x51b   :  { %925 = vmatpush.bf16.msra.mxu2 %v1633_v45  ;;  %938 = vmatpush.bf16.msra.mxu3 %v1641_v48 }
 0x581   :  { %v799_v54 = vpop.f32.mrf.mxu2  ;;  %v812_v51 = vpop.f32.mrf.mxu3 }
 0x582   :  { %v800_v55 = vadd.f32 %v799_v54, %v1769_v25  ;;  %v813_v62 = vadd.f32 %v812_v51, %v1771_v26 }
 0x584   :  { %v818_v61 = vadd.f32 %v816_v46, %v800_v55  ;;  %v819_v1 = vadd.f32 %v817_v50, %v813_v62 }
 0x586   :  { %v820_v2 = vmax.f32 %v818_v61, 0.0  ;;  %v821_v49 = vmax.f32 %v819_v1, 0.0 }
 0x588   :  { %v822_v4 = vpack.c.bf16 %v820_v2, %v820_v2  ;;  %v823_v5 = vpack.c.bf16 %v821_v49, %v821_v49 }
 0x589   :  { %v801_v23 = vpop.f32.mrf.mxu2  ;;  %v814_v24 = vpop.f32.mrf.mxu3 }
 0x58a   :  { %832 = vmatmul.bf16.vlgmr.msrb.gmra.mxu0 %v822_v4  ;;  %845 = vmatmul.bf16.vlgmr.msrb.gmra.mxu1 %v823_v5  ;;  %v1008_v24 = vmul.f32 0.0, %v1763_v6 }
 0x58b   :  { %952 = vmatpush.bf16.msrb.mxu0 %v1659_v8  ;;  %965 = vmatpush.bf16.msrb.mxu1 %v1661_v10 }
 0x58f   :  { %953 = vmatpush.bf16.msrb.mxu0 %v1666_v12  ;;  %966 = vmatpush.bf16.msrb.mxu1 %v1668_v14 }
 0x593   :  { %954 = vmatpush.bf16.msrb.mxu0 %v1674_v15  ;;  %967 = vmatpush.bf16.msrb.mxu1 %v1676_v17 }
 0x597   :  { %955 = vmatpush.bf16.msrb.mxu0 %v1682_v19  ;;  %968 = vmatpush.bf16.msrb.mxu1 %v1684_v20 }
 0x59b   :  { %956 = vmatpush.bf16.msrb.mxu0 %v1723_v52  ;;  %969 = vmatpush.bf16.msrb.mxu1 %v1725_v53 }
 0x59f   :  { %957 = vmatpush.bf16.msrb.mxu0 %v1729_v56  ;;  %970 = vmatpush.bf16.msrb.mxu1 %v1731_v57 }
 0x5a3   :  { %958 = vmatpush.bf16.msrb.mxu0 %v1735_v59  ;;  %971 = vmatpush.bf16.msrb.mxu1 %v1737_v60 }
 0x5a7   :  { %959 = vmatpush.bf16.msrb.mxu0 %v1741_v63  ;;  %972 = vmatpush.bf16.msrb.mxu1 %v1743_v0 }
 0x607   :  { %v833_v27 = vpop.f32.mrf.mxu0  ;;  %v846_v28 = vpop.f32.mrf.mxu1 }
 0x608   :  { %v834_v29 = vadd.f32 %v1800_v44, %v833_v27  ;;  %v1009_v27 = vmul.f32 0.0, %v1765_v11 }
 0x60a   :  { %v847_v32 = vadd.f32 %v846_v28, %v834_v29 }
 0x60c   :  { %v850_v34 = vmul.f32 0.58004344, %v847_v32 }
 0x60e   :  { %v852_v37 = vadd.f32 %v851_v36, %v850_v34 }
 0x60f   :  { %v835_v38 = vpop.f32.mrf.mxu0  ;;  %v848_v39 = vpop.f32.mrf.mxu1 }
 0x610   :  { %v853_v42 = vpack.c.bf16 %v852_v37, %v852_v37 }
 0x612   :  { %862 = vmatmul.bf16.vlgmr.msrb.gmra.mxu2 %v853_v42  ;;  %875 = vmatmul.bf16.vlgmr.msrb.gmra.mxu3 %v853_v42 }
 0x613   :  { %982 = vmatpush.bf16.msrb.mxu2 %v1490_v9  ;;  %995 = vmatpush.bf16.msrb.mxu3 %v1497_v13  ;;  %v880_v9 = vmul.f32 0.25, %v1763_v6  ;;  %v881_v13 = vmul.f32 0.25, %v1765_v11 }
 0x617   :  { %983 = vmatpush.bf16.msrb.mxu2 %v1510_v18  ;;  %996 = vmatpush.bf16.msrb.mxu3 %v1521_v22 }
 0x61b   :  { %984 = vmatpush.bf16.msrb.mxu2 %v1533_v30  ;;  %997 = vmatpush.bf16.msrb.mxu3 %v1536_v33 }
 0x61f   :  { %985 = vmatpush.bf16.msrb.mxu2 %v1550_v41  ;;  %998 = vmatpush.bf16.msrb.mxu3 %v1570_v58 }
 0x623   :  { %986 = vmatpush.bf16.msrb.mxu2 %v1582_v3  ;;  %999 = vmatpush.bf16.msrb.mxu3 %v1587_v7 }
 0x627   :  { %987 = vmatpush.bf16.msrb.mxu2 %v1596_v16  ;;  %1000 = vmatpush.bf16.msrb.mxu3 %v1606_v21 }
 0x62b   :  { %988 = vmatpush.bf16.msrb.mxu2 %v1615_v31  ;;  %1001 = vmatpush.bf16.msrb.mxu3 %v1624_v35 }
 0x62f   :  { %989 = vmatpush.bf16.msrb.mxu2 %v1633_v45  ;;  %1002 = vmatpush.bf16.msrb.mxu3 %v1641_v48 }
 0x695   :  { %v863_v18 = vpop.f32.mrf.mxu2  ;;  %v876_v22 = vpop.f32.mrf.mxu3 }
 0x696   :  { %v864_v30 = vadd.f32 %v863_v18, %v1769_v25  ;;  %v877_v33 = vadd.f32 %v876_v22, %v1771_v26 }
 0x698   :  { %v882_v41 = vadd.f32 %v880_v9, %v864_v30  ;;  %v883_v58 = vadd.f32 %v881_v13, %v877_v33 }
 0x69a   :  { %v884_v3 = vmax.f32 %v882_v41, 0.0  ;;  %v885_v7 = vmax.f32 %v883_v58, 0.0 }
 0x69c   :  { %v886_v16 = vpack.c.bf16 %v884_v3, %v884_v3  ;;  %v887_v21 = vpack.c.bf16 %v885_v7, %v885_v7 }
 0x69d   :  { %v865_v31 = vpop.f32.mrf.mxu2  ;;  %v878_v35 = vpop.f32.mrf.mxu3 }
 0x69e   :  { %896 = vmatmul.bf16.vlgmr.msra.gmra.mxu0 %v886_v16  ;;  %909 = vmatmul.bf16.vlgmr.msra.gmra.mxu1 %v887_v21 }
 0x69f   :  { %1016 = vmatpush.bf16.msra.mxu0 %v1659_v8  ;;  %1029 = vmatpush.bf16.msra.mxu1 %v1661_v10 }
 0x6a3   :  { %1017 = vmatpush.bf16.msra.mxu0 %v1666_v12  ;;  %1030 = vmatpush.bf16.msra.mxu1 %v1668_v14  ;;  %v915_v14 = vmul.f32 0.2908464, %v852_v37 }
 0x6a7   :  { %1018 = vmatpush.bf16.msra.mxu0 %v1674_v15  ;;  %1031 = vmatpush.bf16.msra.mxu1 %v1676_v17 }
 0x6ab   :  { %1019 = vmatpush.bf16.msra.mxu0 %v1682_v19  ;;  %1032 = vmatpush.bf16.msra.mxu1 %v1684_v20 }
 0x6af   :  { %1020 = vmatpush.bf16.msra.mxu0 %v1723_v52  ;;  %1033 = vmatpush.bf16.msra.mxu1 %v1725_v53  ;;  %v944_v52 = vmul.f32 0.125, %v1763_v6  ;;  %v945_v53 = vmul.f32 0.125, %v1765_v11 }
 0x6b3   :  { %1021 = vmatpush.bf16.msra.mxu0 %v1729_v56  ;;  %1034 = vmatpush.bf16.msra.mxu1 %v1731_v57 }
 0x6b7   :  { %1022 = vmatpush.bf16.msra.mxu0 %v1735_v59  ;;  %1035 = vmatpush.bf16.msra.mxu1 %v1737_v60 }
 0x6bb   :  { %1023 = vmatpush.bf16.msra.mxu0 %v1741_v63  ;;  %1036 = vmatpush.bf16.msra.mxu1 %v1743_v0 }
 0x71b   :  { %v897_v45 = vpop.f32.mrf.mxu0  ;;  %v910_v48 = vpop.f32.mrf.mxu1 }
 0x71c   :  { %v898_v8 = vadd.f32 %v1800_v44, %v897_v45 }
 0x71e   :  { %v911_v10 = vadd.f32 %v910_v48, %v898_v8 }
 0x720   :  { %v914_v12 = vmul.f32 0.70915335, %v911_v10 }
 0x722   :  { %v916_v15 = vadd.f32 %v915_v14, %v914_v12 }
 0x723   :  { %v899_v17 = vpop.f32.mrf.mxu0  ;;  %v912_v19 = vpop.f32.mrf.mxu1 }
 0x724   :  { %v917_v20 = vpack.c.bf16 %v916_v15, %v916_v15  ;;  %v979_v2 = vmul.f32 0.10772702, %v916_v15 }
 0x726   :  { %926 = vmatmul.bf16.vlgmr.msra.gmra.mxu2 %v917_v20  ;;  %939 = vmatmul.bf16.vlgmr.msra.gmra.mxu3 %v917_v20 }
 0x7a9   :  { %v927_v56 = vpop.f32.mrf.mxu2  ;;  %v940_v57 = vpop.f32.mrf.mxu3 }
 0x7aa   :  { %v928_v59 = vadd.f32 %v927_v56, %v1769_v25  ;;  %v941_v60 = vadd.f32 %v940_v57, %v1771_v26 }
 0x7ac   :  { %v946_v63 = vadd.f32 %v944_v52, %v928_v59  ;;  %v947_v0 = vadd.f32 %v945_v53, %v941_v60 }
 0x7ae   :  { %v948_v40 = vmax.f32 %v946_v63, 0.0  ;;  %v949_v43 = vmax.f32 %v947_v0, 0.0 }
 0x7b0   :  { %v950_v47 = vpack.c.bf16 %v948_v40, %v948_v40  ;;  %v951_v46 = vpack.c.bf16 %v949_v43, %v949_v43 }
 0x7b1   :  { %v929_v50 = vpop.f32.mrf.mxu2  ;;  %v942_v54 = vpop.f32.mrf.mxu3 }
 0x7b2   :  { %960 = vmatmul.bf16.vlgmr.msrb.gmra.mxu0 %v950_v47  ;;  %973 = vmatmul.bf16.vlgmr.msrb.gmra.mxu1 %v951_v46 }
 0x82f   :  { %v961_v51 = vpop.f32.mrf.mxu0  ;;  %v974_v55 = vpop.f32.mrf.mxu1 }
 0x830   :  { %v962_v62 = vadd.f32 %v1800_v44, %v961_v51 }
 0x832   :  { %v975_v61 = vadd.f32 %v974_v55, %v962_v62 }
 0x834   :  { %v978_v1 = vmul.f32 0.89227295, %v975_v61 }
 0x836   :  { %v980_v49 = vadd.f32 %v979_v2, %v978_v1 }
 0x837   :  { %v963_v4 = vpop.f32.mrf.mxu0  ;;  %v976_v5 = vpop.f32.mrf.mxu1 }
 0x838   :  { %v981_v23 = vpack.c.bf16 %v980_v49, %v980_v49 }
 0x83a   :  { %990 = vmatmul.bf16.vlgmr.msrb.gmra.mxu2 %v981_v23  ;;  %1003 = vmatmul.bf16.vlgmr.msrb.gmra.mxu3 %v981_v23 }
 0x8bd   :  { %v991_v28 = vpop.f32.mrf.mxu2  ;;  %v1004_v29 = vpop.f32.mrf.mxu3 }
 0x8be   :  { %v992_v32 = vadd.f32 %v991_v28, %v1769_v25  ;;  %v1005_v34 = vadd.f32 %v1004_v29, %v1771_v26  ;;  %v1042_v26 = vmul.f32 0.0, %v980_v49 }
 0x8c0   :  { %v1010_v36 = vadd.f32 %v1008_v24, %v992_v32  ;;  %v1011_v37 = vadd.f32 %v1009_v27, %v1005_v34 }
 0x8c2   :  { %v1012_v38 = vmax.f32 %v1010_v36, 0.0  ;;  %v1013_v39 = vmax.f32 %v1011_v37, 0.0 }
 0x8c4   :  { %v1014_v42 = vpack.c.bf16 %v1012_v38, %v1012_v38  ;;  %v1015_v9 = vpack.c.bf16 %v1013_v39, %v1013_v39 }
 0x8c5   :  { %v993_v13 = vpop.f32.mrf.mxu2  ;;  %v1006_v18 = vpop.f32.mrf.mxu3 }
 0x8c6   :  { %1024 = vmatmul.bf16.vlgmr.msra.gmra.mxu0 %v1014_v42  ;;  %1037 = vmatmul.bf16.vlgmr.msra.gmra.mxu1 %v1015_v9 }
 0x943   :  { %v1025_v22 = vpop.f32.mrf.mxu0  ;;  %v1038_v6 = vpop.f32.mrf.mxu1 }
 0x944   :  { %v1026_v11 = vadd.f32 %v1800_v44, %v1025_v22 }
 0x946   :  { %v1039_v25 = vadd.f32 %v1038_v6, %v1026_v11 }
 0x948   :  { %v1043_v30 = vadd.f32 %v1042_v26, %v1039_v25 }
 0x94a   :  { %1044 = vst [vmem:[#allocation7] sm:$0x3] %v1043_v30 }
 0x94b   :  { %v1027_v33 = vpop.f32.mrf.mxu0  ;;  %v1040_v41 = vpop.f32.mrf.mxu1  ;;  %1055 = dma.vmem_to_hbm [thread:$0]  %s1051_s27, 32, %s1053_s29, [#allocation4]  }
 0x94c   :  { %1399 = dma.done.wait [#allocation4], 32  }
 0x94d   :  { %1400 = vsyncadd [#allocation4], 4294967264 }
 0x94e   :  { %1060 = vsyncpa [#allocation3], 1 }
 0x94f   :  { %1061 = vsyncpa [#allocation6], 1 }
 0x950   :  { %1062 = vsyncpa [#allocation4], 1 }

</bundles_post_ra>
